<compile_context>
chip_gen: v5e
topology: v5e:2x2
jax: 0.10.0
libtpu: 0.0.40
codegen_flags: <defaults>
</compile_context>

<pallas_src>
import math

import jax
import jax.numpy as jnp
from jax.experimental import pallas as pl
from jax.experimental.pallas import tpu as pltpu

# ----------------------------- model config ---------------------------------
VOCAB = 64
HIDDEN = 32
N_LAYERS = 2
N_HEADS = 4
HEAD_DIM = HIDDEN // N_HEADS
INTERMEDIATE = 64
MAX_POS = 16
TYPE_VOCAB = 2
NUM_LABELS = 5
LN_EPS = 1e-12
BATCH = 2
SEQ = 8

EMB_ROWS = VOCAB + MAX_POS + TYPE_VOCAB          # 82
EMB_ROWS_PAD = ((EMB_ROWS + 7) // 8) * 8         # 88 (aligned; padded rows are zeros / never hot)


# ----------------------------- parameter slab layout -------------------------
def _build_slab_layout():
    off = {}
    cur = 0

    def alloc(name, rows):
        nonlocal cur
        off[name] = cur
        cur += ((rows + 7) // 8) * 8             # keep every block sublane-tile aligned

    alloc("emb", EMB_ROWS)                       # word(64) | pos(16) | type(2) stacked, width 32
    alloc("emb_ln", 2)                           # row 0: gamma, row 1: beta
    for l in range(N_LAYERS):
        alloc(f"qkv_w{l}", HIDDEN)               # (32, 96)
        alloc(f"o_w{l}", HIDDEN)                 # (32, 32)
        alloc(f"fc1_w{l}", HIDDEN)               # (32, 64)
        alloc(f"fc2_w{l}", INTERMEDIATE)         # (64, 32)
        alloc(f"bias{l}", 8)                     # 8 rows: qkv_b,o_b,ln1_g,ln1_b,fc1_b,fc2_b,ln2_g,ln2_b
    alloc("cls_w", HIDDEN)                       # (32, 5)
    alloc("cls_b", 1)                            # (1, 5)
    return off, ((cur + 7) // 8) * 8


SLAB_OFF, SLAB_ROWS = _build_slab_layout()       # 472 rows
SLAB_COLS = 128                                  # lane-aligned slab width


# ----------------------------- fused Pallas kernel ---------------------------
def _layernorm(h, g, b, eps=LN_EPS):
    mean = jnp.mean(h, axis=-1, keepdims=True)
    var = jnp.mean((h - mean) * (h - mean), axis=-1, keepdims=True)
    return (h - mean) * jax.lax.rsqrt(var + eps) * g + b


def _fused_bert_kernel(slab_ref, ints_ref, amask_ref, logits_ref, loss_ref):
    B, S, H, NH, Dh = BATCH, SEQ, HIDDEN, N_HEADS, HEAD_DIM
    IM, NL = INTERMEDIATE, NUM_LABELS
    M = B * S
    scale = 1.0 / math.sqrt(Dh)

    # Static views into the packed parameter slab (zero-cost slicing of a VMEM ref).
    def mat(name, rows, cols):
        off = SLAB_OFF[name]
        return slab_ref[off:off + rows, 0:cols]

    def vec(name, row, cols):
        off = SLAB_OFF[name] + row
        return slab_ref[off:off + 1, 0:cols]

    # -------- packed int inputs: [word_id, type_id, attn_mask, label, pos_id] --------
    ints = ints_ref[...]                                   # (M, 5) int32
    word_ids = ints[:, 0:1]
    type_ids = ints[:, 1:2]
    tok_mask = ints[:, 2:3]
    labels = ints[:, 3:4]
    pos_ids = ints[:, 4:5]

    # -------- embedding lookup: one multi-hot (M, 88) x (88, 32) MXU matmul --------
    col = jax.lax.broadcasted_iota(jnp.int32, (M, EMB_ROWS_PAD), 1)
    hot = ((col == word_ids)
           | (col == VOCAB + pos_ids)
           | (col == VOCAB + MAX_POS + type_ids)).astype(jnp.float32)
    emb = jnp.dot(hot, mat("emb", EMB_ROWS_PAD, H), preferred_element_type=jnp.float32)

    h = _layernorm(emb, vec("emb_ln", 0, H), vec("emb_ln", 1, H))

    # Additive attention mask (B, 1, S): 0 for real tokens, large negative for padding.
    mask3 = ((1.0 - amask_ref[...].astype(jnp.float32)) * -1e9).reshape(B, 1, S)

    for l in range(N_LAYERS):
        # ----- fused QKV projection: one (M,H) x (H,3H) MXU pass -----
        qkv = (jnp.dot(h, mat(f"qkv_w{l}", H, 3 * H), preferred_element_type=jnp.float32)
               + vec(f"bias{l}", 0, 3 * H))
        q3 = qkv[:, 0:H].reshape(B, S, H)
        k3 = qkv[:, H:2 * H].reshape(B, S, H)
        v3 = qkv[:, 2 * H:3 * H].reshape(B, S, H)

        # ----- attention: batched over B per head, K-transpose folded into the einsum -----
        ctx_heads = []
        for hh in range(NH):
            c0, c1 = hh * Dh, (hh + 1) * Dh
            qh, kh, vh = q3[:, :, c0:c1], k3[:, :, c0:c1], v3[:, :, c0:c1]
            sc = jnp.einsum("bqd,bkd->bqk", qh, kh,
                            preferred_element_type=jnp.float32) * scale + mask3
            mmax = jnp.max(sc, axis=-1, keepdims=True)
            p = jnp.exp(sc - mmax)
            p = p * pl.reciprocal(jnp.sum(p, axis=-1, keepdims=True), approx=True)
            ctx_heads.append(jnp.einsum("bqk,bkd->bqd", p, vh,
                                        preferred_element_type=jnp.float32))
        ctx = jnp.concatenate(ctx_heads, axis=-1).reshape(M, H)   # values only, no VMEM scratch

        attn_out = (jnp.dot(ctx, mat(f"o_w{l}", H, H), preferred_element_type=jnp.float32)
                    + vec(f"bias{l}", 1, H))
        h = _layernorm(attn_out + h, vec(f"bias{l}", 2, H), vec(f"bias{l}", 3, H))

        ff = (jnp.dot(h, mat(f"fc1_w{l}", H, IM), preferred_element_type=jnp.float32)
              + vec(f"bias{l}", 4, IM))
        # TODO(synk): HF BERT uses exact erf GELU; tanh approximation used here (EUP tanh).
        ff = jax.nn.gelu(ff, approximate=True)
        ff = (jnp.dot(ff, mat(f"fc2_w{l}", IM, H), preferred_element_type=jnp.float32)
              + vec(f"bias{l}", 5, H))
        h = _layernorm(ff + h, vec(f"bias{l}", 6, H), vec(f"bias{l}", 7, H))

    # Dropout: identity (frozen BERT / eval mode).
    # -------- token-classification head + masked-mean cross-entropy --------
    logits = (jnp.dot(h, mat("cls_w", H, NL), preferred_element_type=jnp.float32)
              + vec("cls_b", 0, NL))
    logits_ref[...] = logits.astype(logits_ref.dtype)

    mmax = jnp.max(logits, axis=-1, keepdims=True)
    lse = jnp.log(jnp.sum(jnp.exp(logits - mmax), axis=-1, keepdims=True)) + mmax   # (M,1)
    classes = jax.lax.broadcasted_iota(jnp.int32, logits.shape, 1)                  # (M,NL)
    labels_safe = jnp.maximum(labels, 0)
    onehot = (classes == labels_safe).astype(jnp.float32)
    picked = jnp.sum(logits * onehot, axis=-1, keepdims=True)
    per_tok = lse - picked                                                          # (M,1)
    # CrossEntropyLoss(ignore_index=-100) semantics: attended tokens with a valid label.
    active = jnp.logical_and(tok_mask == 1, labels >= 0).astype(jnp.float32)        # (M,1)
    total = jnp.sum(per_tok * active)
    count = jnp.maximum(jnp.sum(active), 1.0)      # guard: fully-masked batch -> loss 0, not NaN
    loss_ref[...] = jnp.reshape(total / count, (1, 1))


def pallas_fused_forward(slab, ints, attn_mask):
    M = ints.shape[0]

    def full_spec(shape):
        return pl.BlockSpec(shape, lambda i: (0,) * len(shape))

    logits, loss = pl.pallas_call(
        _fused_bert_kernel,
        out_shape=(
            jax.ShapeDtypeStruct((M, NUM_LABELS), jnp.float32),
            jax.ShapeDtypeStruct((1, 1), jnp.float32),
        ),
        grid=(1,),
        in_specs=[full_spec(slab.shape), full_spec(ints.shape), full_spec(attn_mask.shape)],
        out_specs=(
            pl.BlockSpec((M, NUM_LABELS), lambda i: (0, 0)),
            pl.BlockSpec((1, 1), lambda i: (0, 0)),
        ),
        compiler_params=pltpu.CompilerParams(dimension_semantics=("arbitrary",)),
    )(slab, ints, attn_mask)
    return logits, loss


# ----------------------------- parameter init & packing ----------------------
def init_params(key):
    ks = iter(jax.random.split(key, 64))

    def w(shape, scale=0.02):
        return scale * jax.random.normal(next(ks), shape, dtype=jnp.float32)

    L, H, I = N_LAYERS, HIDDEN, INTERMEDIATE
    return {
        "word_emb": w((VOCAB, H)),
        "pos_emb": w((MAX_POS, H)),
        "type_emb": w((TYPE_VOCAB, H)),
        "emb_ln_g": jnp.ones((1, H), jnp.float32),
        "emb_ln_b": jnp.zeros((1, H), jnp.float32),
        "qkv_w": w((L, H, 3 * H)),
        "qkv_b": jnp.zeros((L, 1, 3 * H), jnp.float32),
        "o_w": w((L, H, H)),
        "o_b": jnp.zeros((L, 1, H), jnp.float32),
        "ln1_g": jnp.ones((L, 1, H), jnp.float32),
        "ln1_b": jnp.zeros((L, 1, H), jnp.float32),
        "fc1_w": w((L, H, I)),
        "fc1_b": jnp.zeros((L, 1, I), jnp.float32),
        "fc2_w": w((L, I, H)),
        "fc2_b": jnp.zeros((L, 1, H), jnp.float32),
        "ln2_g": jnp.ones((L, 1, H), jnp.float32),
        "ln2_b": jnp.zeros((L, 1, H), jnp.float32),
        "cls_w": w((H, NUM_LABELS)),
        "cls_b": jnp.zeros((1, NUM_LABELS), jnp.float32),
    }


def pack_params(p):
    """Pack every parameter into one (SLAB_ROWS, 128) f32 slab -> a single HBM->VMEM DMA."""
    slab = jnp.zeros((SLAB_ROWS, SLAB_COLS), jnp.float32)

    def put(slab, name, arr, row=0):
        arr = jnp.asarray(arr, jnp.float32)
        if arr.ndim == 1:
            arr = arr[None, :]
        r, c = arr.shape
        off = SLAB_OFF[name] + row
        return slab.at[off:off + r, 0:c].set(arr)

    slab = put(slab, "emb",
               jnp.concatenate([p["word_emb"], p["pos_emb"], p["type_emb"]], axis=0))
    slab = put(slab, "emb_ln", p["emb_ln_g"], 0)
    slab = put(slab, "emb_ln", p["emb_ln_b"], 1)
    for l in range(N_LAYERS):
        slab = put(slab, f"qkv_w{l}", p["qkv_w"][l])
        slab = put(slab, f"o_w{l}", p["o_w"][l])
        slab = put(slab, f"fc1_w{l}", p["fc1_w"][l])
        slab = put(slab, f"fc2_w{l}", p["fc2_w"][l])
        b = f"bias{l}"
        slab = put(slab, b, p["qkv_b"][l], 0)
        slab = put(slab, b, p["o_b"][l], 1)
        slab = put(slab, b, p["ln1_g"][l], 2)
        slab = put(slab, b, p["ln1_b"][l], 3)
        slab = put(slab, b, p["fc1_b"][l], 4)
        slab = put(slab, b, p["fc2_b"][l], 5)
        slab = put(slab, b, p["ln2_g"][l], 6)
        slab = put(slab, b, p["ln2_b"][l], 7)
    slab = put(slab, "cls_w", p["cls_w"])
    slab = put(slab, "cls_b", p["cls_b"])
    return slab


# ----------------------------- forward pass ----------------------------------
def custom_bert_forward(param_slab, input_ids, attention_mask, token_type_ids, labels):
    B, S = input_ids.shape
    M = B * S

    # Everything the kernel needs as integers, packed into ONE (M, 5) int32 array:
    # [word_id, type_id, attn_mask, label, pos_id].  Embedding lookup, mask building and
    # loss masking all happen inside the fused kernel.
    pos_ids = jnp.tile(jnp.arange(S, dtype=jnp.int32), B)
    ints = jnp.stack([
        input_ids.reshape(-1).astype(jnp.int32),
        token_type_ids.reshape(-1).astype(jnp.int32),
        attention_mask.reshape(-1).astype(jnp.int32),
        labels.reshape(-1).astype(jnp.int32),
        pos_ids,
    ], axis=1)                                              # (M, 5)

    logits_flat, loss = pallas_fused_forward(param_slab, ints, attention_mask.astype(jnp.int32))
    return loss[0, 0], logits_flat.reshape(B, S, NUM_LABELS)


# --------------------------------- main ---------------------------------------
if __name__ == "__main__":
    key = jax.random.PRNGKey(0)
    kp, ki, kl = jax.random.split(key, 3)

    params = init_params(kp)
    param_slab = pack_params(params)        # packed once, host-side

    input_ids = jax.random.randint(ki, (BATCH, SEQ), 0, VOCAB, dtype=jnp.int32)
    token_type_ids = jnp.zeros((BATCH, SEQ), dtype=jnp.int32)
    # variable-length sequences: batch 0 full, batch 1 has 5 real tokens
    lengths = jnp.array([SEQ, 5], dtype=jnp.int32)
    attention_mask = (jnp.arange(SEQ)[None, :] < lengths[:, None]).astype(jnp.int32)
    labels = jax.random.randint(kl, (BATCH, SEQ), 0, NUM_LABELS, dtype=jnp.int32)

    forward = jax.jit(custom_bert_forward)
    loss, logits = forward(param_slab, input_ids, attention_mask, token_type_ids, labels)
    jax.block_until_ready((loss, logits))

    assert logits.shape == (BATCH, SEQ, NUM_LABELS)
    assert jnp.isfinite(loss)
    print("KERNEL_OK")
</pallas_src>

<mosaic_0001>
module attributes {stable_mosaic.version = 11 : i64} {
  func.func @_fused_bert_kernel(%arg0: i32, %arg1: memref<472x128xf32, #tpu.memory_space<vmem>>, %arg2: memref<16x5xi32, #tpu.memory_space<vmem>>, %arg3: memref<2x8xi32, #tpu.memory_space<vmem>>, %arg4: memref<16x5xf32, #tpu.memory_space<vmem>>, %arg5: memref<1x1xf32, #tpu.memory_space<vmem>>) attributes {dimension_semantics = [#tpu.dimension_semantics<arbitrary>], iteration_bounds = array<i64: 1>, scalar_prefetch = 0 : i64, scratch_operands = 0 : i64, tpu.core_type = #tpu.core_type<tc>, window_params = [{pipeline_mode = #tpu.pipeline_mode<synchronous>, transform_indices = @transform_0, window_bounds = array<i64: 472, 128>}, {pipeline_mode = #tpu.pipeline_mode<synchronous>, transform_indices = @transform_1, window_bounds = array<i64: 16, 5>}, {pipeline_mode = #tpu.pipeline_mode<synchronous>, transform_indices = @transform_2, window_bounds = array<i64: 2, 8>}, {pipeline_mode = #tpu.pipeline_mode<synchronous>, transform_indices = @transform_3, window_bounds = array<i64: 16, 5>}, {pipeline_mode = #tpu.pipeline_mode<synchronous>, transform_indices = @transform_4, window_bounds = array<i64: 1, 1>}]} {
    %c0 = arith.constant 0 : index
    %c0_0 = arith.constant 0 : index
    %0 = vector.load %arg2[%c0, %c0_0] : memref<16x5xi32, #tpu.memory_space<vmem>>, vector<16x5xi32>
    %1 = vector.extract_strided_slice %0 {offsets = [0, 0], sizes = [16, 1], strides = [1, 1]} : vector<16x5xi32> to vector<16x1xi32>
    %2 = vector.extract_strided_slice %0 {offsets = [0, 1], sizes = [16, 1], strides = [1, 1]} : vector<16x5xi32> to vector<16x1xi32>
    %3 = vector.extract_strided_slice %0 {offsets = [0, 2], sizes = [16, 1], strides = [1, 1]} : vector<16x5xi32> to vector<16x1xi32>
    %4 = vector.extract_strided_slice %0 {offsets = [0, 3], sizes = [16, 1], strides = [1, 1]} : vector<16x5xi32> to vector<16x1xi32>
    %5 = vector.extract_strided_slice %0 {offsets = [0, 4], sizes = [16, 1], strides = [1, 1]} : vector<16x5xi32> to vector<16x1xi32>
    %6 = tpu.iota {dimensions = array<i32: 1>} : vector<16x88xi32>
    %7 = vector.broadcast %1 : vector<16x1xi32> to vector<16x88xi32>
    %8 = arith.cmpi eq, %6, %7 : vector<16x88xi32>
    %c64_i32 = arith.constant 64 : i32
    %9 = vector.broadcast %c64_i32 : i32 to vector<16x1xi32>
    %10 = arith.addi %9, %5 : vector<16x1xi32>
    %11 = vector.broadcast %10 : vector<16x1xi32> to vector<16x88xi32>
    %12 = arith.cmpi eq, %6, %11 : vector<16x88xi32>
    %13 = arith.ori %8, %12 : vector<16x88xi1>
    %c80_i32 = arith.constant 80 : i32
    %14 = vector.broadcast %c80_i32 : i32 to vector<16x1xi32>
    %15 = arith.addi %14, %2 : vector<16x1xi32>
    %16 = vector.broadcast %15 : vector<16x1xi32> to vector<16x88xi32>
    %17 = arith.cmpi eq, %6, %16 : vector<16x88xi32>
    %18 = arith.ori %13, %17 : vector<16x88xi1>
    %19 = arith.extui %18 : vector<16x88xi1> to vector<16x88xi32>
    %20 = arith.sitofp %19 : vector<16x88xi32> to vector<16x88xf32>
    %c0_1 = arith.constant 0 : index
    %c0_2 = arith.constant 0 : index
    %21 = vector.load %arg1[%c0_1, %c0_2] : memref<472x128xf32, #tpu.memory_space<vmem>>, vector<88x32xf32>
    %cst = arith.constant dense<0.000000e+00> : vector<16x32xf32>
    %22 = tpu.matmul %20, %21, %cst {dimension_numbers = #tpu.dot_dimension_numbers<[1], [0], [0], [1], [0, 0, 1, 1], [], []>} : vector<16x88xf32>, vector<88x32xf32>, vector<16x32xf32> -> vector<16x32xf32>
    %c88 = arith.constant 88 : index
    %c0_3 = arith.constant 0 : index
    %23 = vector.load %arg1[%c88, %c0_3] : memref<472x128xf32, #tpu.memory_space<vmem>>, vector<1x32xf32>
    %c89 = arith.constant 89 : index
    %c0_4 = arith.constant 0 : index
    %24 = vector.load %arg1[%c89, %c0_4] : memref<472x128xf32, #tpu.memory_space<vmem>>, vector<1x32xf32>
    %cst_5 = arith.constant dense<0.000000e+00> : vector<16xf32>
    %25 = vector.multi_reduction <add>, %22, %cst_5 [1] : vector<16x32xf32> to vector<16xf32>
    %26 = vector.shape_cast %25 : vector<16xf32> to vector<16x1xf32>
    %cst_6 = arith.constant 3.200000e+01 : f32
    %27 = vector.broadcast %cst_6 : f32 to vector<16x1xf32>
    %28 = arith.divf %26, %27 : vector<16x1xf32>
    %29 = vector.broadcast %28 : vector<16x1xf32> to vector<16x32xf32>
    %30 = arith.subf %22, %29 : vector<16x32xf32>
    %31 = vector.broadcast %28 : vector<16x1xf32> to vector<16x32xf32>
    %32 = arith.subf %22, %31 : vector<16x32xf32>
    %33 = arith.mulf %30, %32 : vector<16x32xf32>
    %cst_7 = arith.constant dense<0.000000e+00> : vector<16xf32>
    %34 = vector.multi_reduction <add>, %33, %cst_7 [1] : vector<16x32xf32> to vector<16xf32>
    %35 = vector.shape_cast %34 : vector<16xf32> to vector<16x1xf32>
    %cst_8 = arith.constant 3.200000e+01 : f32
    %36 = vector.broadcast %cst_8 : f32 to vector<16x1xf32>
    %37 = arith.divf %35, %36 : vector<16x1xf32>
    %38 = vector.broadcast %28 : vector<16x1xf32> to vector<16x32xf32>
    %39 = arith.subf %22, %38 : vector<16x32xf32>
    %cst_9 = arith.constant 9.99999996E-13 : f32
    %40 = vector.broadcast %cst_9 : f32 to vector<16x1xf32>
    %41 = arith.addf %37, %40 : vector<16x1xf32>
    %42 = math.rsqrt %41 : vector<16x1xf32>
    %43 = vector.broadcast %42 : vector<16x1xf32> to vector<16x32xf32>
    %44 = arith.mulf %39, %43 : vector<16x32xf32>
    %45 = vector.broadcast %23 : vector<1x32xf32> to vector<16x32xf32>
    %46 = arith.mulf %44, %45 : vector<16x32xf32>
    %47 = vector.broadcast %24 : vector<1x32xf32> to vector<16x32xf32>
    %48 = arith.addf %46, %47 : vector<16x32xf32>
    %c0_10 = arith.constant 0 : index
    %c0_11 = arith.constant 0 : index
    %49 = vector.load %arg3[%c0_10, %c0_11] : memref<2x8xi32, #tpu.memory_space<vmem>>, vector<2x8xi32>
    %50 = arith.sitofp %49 : vector<2x8xi32> to vector<2x8xf32>
    %cst_12 = arith.constant 1.000000e+00 : f32
    %51 = vector.broadcast %cst_12 : f32 to vector<2x8xf32>
    %52 = arith.subf %51, %50 : vector<2x8xf32>
    %cst_13 = arith.constant -1.000000e+09 : f32
    %53 = vector.broadcast %cst_13 : f32 to vector<2x8xf32>
    %54 = arith.mulf %52, %53 : vector<2x8xf32>
    %55 = vector.shape_cast %54 : vector<2x8xf32> to vector<2x1x8xf32>
    %c96 = arith.constant 96 : index
    %c0_14 = arith.constant 0 : index
    %56 = vector.load %arg1[%c96, %c0_14] : memref<472x128xf32, #tpu.memory_space<vmem>>, vector<32x96xf32>
    %cst_15 = arith.constant dense<0.000000e+00> : vector<16x96xf32>
    %57 = tpu.matmul %48, %56, %cst_15 {dimension_numbers = #tpu.dot_dimension_numbers<[1], [0], [0], [1], [0, 0, 1, 1], [], []>} : vector<16x32xf32>, vector<32x96xf32>, vector<16x96xf32> -> vector<16x96xf32>
    %c256 = arith.constant 256 : index
    %c0_16 = arith.constant 0 : index
    %58 = vector.load %arg1[%c256, %c0_16] : memref<472x128xf32, #tpu.memory_space<vmem>>, vector<1x96xf32>
    %59 = vector.broadcast %58 : vector<1x96xf32> to vector<16x96xf32>
    %60 = arith.addf %57, %59 : vector<16x96xf32>
    %61 = vector.extract_strided_slice %60 {offsets = [0, 0], sizes = [16, 32], strides = [1, 1]} : vector<16x96xf32> to vector<16x32xf32>
    %62 = vector.shape_cast %61 : vector<16x32xf32> to vector<2x8x32xf32>
    %63 = vector.extract_strided_slice %60 {offsets = [0, 32], sizes = [16, 32], strides = [1, 1]} : vector<16x96xf32> to vector<16x32xf32>
    %64 = vector.shape_cast %63 : vector<16x32xf32> to vector<2x8x32xf32>
    %65 = vector.extract_strided_slice %60 {offsets = [0, 64], sizes = [16, 32], strides = [1, 1]} : vector<16x96xf32> to vector<16x32xf32>
    %66 = vector.shape_cast %65 : vector<16x32xf32> to vector<2x8x32xf32>
    %67 = vector.extract_strided_slice %62 {offsets = [0, 0, 0], sizes = [2, 8, 8], strides = [1, 1, 1]} : vector<2x8x32xf32> to vector<2x8x8xf32>
    %68 = vector.extract_strided_slice %64 {offsets = [0, 0, 0], sizes = [2, 8, 8], strides = [1, 1, 1]} : vector<2x8x32xf32> to vector<2x8x8xf32>
    %69 = vector.extract_strided_slice %66 {offsets = [0, 0, 0], sizes = [2, 8, 8], strides = [1, 1, 1]} : vector<2x8x32xf32> to vector<2x8x8xf32>
    "tpu.trace_start"() <{level = 10 : i32, message = "bqd,bkd->bqk"}> : () -> ()
    %cst_17 = arith.constant dense<0.000000e+00> : vector<2x8x8xf32>
    %70 = tpu.matmul %67, %68, %cst_17 {dimension_numbers = #tpu.dot_dimension_numbers<[2], [2], [1], [1], [0, 0, 0, 1, 1, 1], [0], [0]>} : vector<2x8x8xf32>, vector<2x8x8xf32>, vector<2x8x8xf32> -> vector<2x8x8xf32>
    "tpu.trace_stop"() : () -> ()
    %cst_18 = arith.constant 0.353553385 : f32
    %71 = vector.broadcast %cst_18 : f32 to vector<2x8x8xf32>
    %72 = arith.mulf %70, %71 : vector<2x8x8xf32>
    %73 = vector.broadcast %55 : vector<2x1x8xf32> to vector<2x8x8xf32>
    %74 = arith.addf %72, %73 : vector<2x8x8xf32>
    %cst_19 = arith.constant dense<0xFF800000> : vector<2x8xf32>
    %75 = vector.multi_reduction <maximumf>, %74, %cst_19 [2] : vector<2x8x8xf32> to vector<2x8xf32>
    %76 = vector.shape_cast %75 : vector<2x8xf32> to vector<2x8x1xf32>
    %77 = vector.broadcast %76 : vector<2x8x1xf32> to vector<2x8x8xf32>
    %78 = arith.subf %74, %77 : vector<2x8x8xf32>
    %79 = math.exp %78 : vector<2x8x8xf32>
    %cst_20 = arith.constant dense<0.000000e+00> : vector<2x8xf32>
    %80 = vector.multi_reduction <add>, %79, %cst_20 [2] : vector<2x8x8xf32> to vector<2x8xf32>
    %81 = vector.shape_cast %80 : vector<2x8xf32> to vector<2x8x1xf32>
    %82 = tpu.reciprocal %81 {approx = true} : vector<2x8x1xf32> -> vector<2x8x1xf32>
    %83 = vector.broadcast %82 : vector<2x8x1xf32> to vector<2x8x8xf32>
    %84 = arith.mulf %79, %83 : vector<2x8x8xf32>
    "tpu.trace_start"() <{level = 10 : i32, message = "bqk,bkd->bqd"}> : () -> ()
    %cst_21 = arith.constant dense<0.000000e+00> : vector<2x8x8xf32>
    %85 = tpu.matmul %84, %69, %cst_21 {dimension_numbers = #tpu.dot_dimension_numbers<[2], [1], [1], [2], [0, 0, 0, 1, 1, 2], [0], [0]>} : vector<2x8x8xf32>, vector<2x8x8xf32>, vector<2x8x8xf32> -> vector<2x8x8xf32>
    "tpu.trace_stop"() : () -> ()
    %86 = vector.extract_strided_slice %62 {offsets = [0, 0, 8], sizes = [2, 8, 8], strides = [1, 1, 1]} : vector<2x8x32xf32> to vector<2x8x8xf32>
    %87 = vector.extract_strided_slice %64 {offsets = [0, 0, 8], sizes = [2, 8, 8], strides = [1, 1, 1]} : vector<2x8x32xf32> to vector<2x8x8xf32>
    %88 = vector.extract_strided_slice %66 {offsets = [0, 0, 8], sizes = [2, 8, 8], strides = [1, 1, 1]} : vector<2x8x32xf32> to vector<2x8x8xf32>
    "tpu.trace_start"() <{level = 10 : i32, message = "bqd,bkd->bqk"}> : () -> ()
    %cst_22 = arith.constant dense<0.000000e+00> : vector<2x8x8xf32>
    %89 = tpu.matmul %86, %87, %cst_22 {dimension_numbers = #tpu.dot_dimension_numbers<[2], [2], [1], [1], [0, 0, 0, 1, 1, 1], [0], [0]>} : vector<2x8x8xf32>, vector<2x8x8xf32>, vector<2x8x8xf32> -> vector<2x8x8xf32>
    "tpu.trace_stop"() : () -> ()
    %cst_23 = arith.constant 0.353553385 : f32
    %90 = vector.broadcast %cst_23 : f32 to vector<2x8x8xf32>
    %91 = arith.mulf %89, %90 : vector<2x8x8xf32>
    %92 = vector.broadcast %55 : vector<2x1x8xf32> to vector<2x8x8xf32>
    %93 = arith.addf %91, %92 : vector<2x8x8xf32>
    %cst_24 = arith.constant dense<0xFF800000> : vector<2x8xf32>
    %94 = vector.multi_reduction <maximumf>, %93, %cst_24 [2] : vector<2x8x8xf32> to vector<2x8xf32>
    %95 = vector.shape_cast %94 : vector<2x8xf32> to vector<2x8x1xf32>
    %96 = vector.broadcast %95 : vector<2x8x1xf32> to vector<2x8x8xf32>
    %97 = arith.subf %93, %96 : vector<2x8x8xf32>
    %98 = math.exp %97 : vector<2x8x8xf32>
    %cst_25 = arith.constant dense<0.000000e+00> : vector<2x8xf32>
    %99 = vector.multi_reduction <add>, %98, %cst_25 [2] : vector<2x8x8xf32> to vector<2x8xf32>
    %100 = vector.shape_cast %99 : vector<2x8xf32> to vector<2x8x1xf32>
    %101 = tpu.reciprocal %100 {approx = true} : vector<2x8x1xf32> -> vector<2x8x1xf32>
    %102 = vector.broadcast %101 : vector<2x8x1xf32> to vector<2x8x8xf32>
    %103 = arith.mulf %98, %102 : vector<2x8x8xf32>
    "tpu.trace_start"() <{level = 10 : i32, message = "bqk,bkd->bqd"}> : () -> ()
    %cst_26 = arith.constant dense<0.000000e+00> : vector<2x8x8xf32>
    %104 = tpu.matmul %103, %88, %cst_26 {dimension_numbers = #tpu.dot_dimension_numbers<[2], [1], [1], [2], [0, 0, 0, 1, 1, 2], [0], [0]>} : vector<2x8x8xf32>, vector<2x8x8xf32>, vector<2x8x8xf32> -> vector<2x8x8xf32>
    "tpu.trace_stop"() : () -> ()
    %105 = vector.extract_strided_slice %62 {offsets = [0, 0, 16], sizes = [2, 8, 8], strides = [1, 1, 1]} : vector<2x8x32xf32> to vector<2x8x8xf32>
    %106 = vector.extract_strided_slice %64 {offsets = [0, 0, 16], sizes = [2, 8, 8], strides = [1, 1, 1]} : vector<2x8x32xf32> to vector<2x8x8xf32>
    %107 = vector.extract_strided_slice %66 {offsets = [0, 0, 16], sizes = [2, 8, 8], strides = [1, 1, 1]} : vector<2x8x32xf32> to vector<2x8x8xf32>
    "tpu.trace_start"() <{level = 10 : i32, message = "bqd,bkd->bqk"}> : () -> ()
    %cst_27 = arith.constant dense<0.000000e+00> : vector<2x8x8xf32>
    %108 = tpu.matmul %105, %106, %cst_27 {dimension_numbers = #tpu.dot_dimension_numbers<[2], [2], [1], [1], [0, 0, 0, 1, 1, 1], [0], [0]>} : vector<2x8x8xf32>, vector<2x8x8xf32>, vector<2x8x8xf32> -> vector<2x8x8xf32>
    "tpu.trace_stop"() : () -> ()
    %cst_28 = arith.constant 0.353553385 : f32
    %109 = vector.broadcast %cst_28 : f32 to vector<2x8x8xf32>
    %110 = arith.mulf %108, %109 : vector<2x8x8xf32>
    %111 = vector.broadcast %55 : vector<2x1x8xf32> to vector<2x8x8xf32>
    %112 = arith.addf %110, %111 : vector<2x8x8xf32>
    %cst_29 = arith.constant dense<0xFF800000> : vector<2x8xf32>
    %113 = vector.multi_reduction <maximumf>, %112, %cst_29 [2] : vector<2x8x8xf32> to vector<2x8xf32>
    %114 = vector.shape_cast %113 : vector<2x8xf32> to vector<2x8x1xf32>
    %115 = vector.broadcast %114 : vector<2x8x1xf32> to vector<2x8x8xf32>
    %116 = arith.subf %112, %115 : vector<2x8x8xf32>
    %117 = math.exp %116 : vector<2x8x8xf32>
    %cst_30 = arith.constant dense<0.000000e+00> : vector<2x8xf32>
    %118 = vector.multi_reduction <add>, %117, %cst_30 [2] : vector<2x8x8xf32> to vector<2x8xf32>
    %119 = vector.shape_cast %118 : vector<2x8xf32> to vector<2x8x1xf32>
    %120 = tpu.reciprocal %119 {approx = true} : vector<2x8x1xf32> -> vector<2x8x1xf32>
    %121 = vector.broadcast %120 : vector<2x8x1xf32> to vector<2x8x8xf32>
    %122 = arith.mulf %117, %121 : vector<2x8x8xf32>
    "tpu.trace_start"() <{level = 10 : i32, message = "bqk,bkd->bqd"}> : () -> ()
    %cst_31 = arith.constant dense<0.000000e+00> : vector<2x8x8xf32>
    %123 = tpu.matmul %122, %107, %cst_31 {dimension_numbers = #tpu.dot_dimension_numbers<[2], [1], [1], [2], [0, 0, 0, 1, 1, 2], [0], [0]>} : vector<2x8x8xf32>, vector<2x8x8xf32>, vector<2x8x8xf32> -> vector<2x8x8xf32>
    "tpu.trace_stop"() : () -> ()
    %124 = vector.extract_strided_slice %62 {offsets = [0, 0, 24], sizes = [2, 8, 8], strides = [1, 1, 1]} : vector<2x8x32xf32> to vector<2x8x8xf32>
    %125 = vector.extract_strided_slice %64 {offsets = [0, 0, 24], sizes = [2, 8, 8], strides = [1, 1, 1]} : vector<2x8x32xf32> to vector<2x8x8xf32>
    %126 = vector.extract_strided_slice %66 {offsets = [0, 0, 24], sizes = [2, 8, 8], strides = [1, 1, 1]} : vector<2x8x32xf32> to vector<2x8x8xf32>
    "tpu.trace_start"() <{level = 10 : i32, message = "bqd,bkd->bqk"}> : () -> ()
    %cst_32 = arith.constant dense<0.000000e+00> : vector<2x8x8xf32>
    %127 = tpu.matmul %124, %125, %cst_32 {dimension_numbers = #tpu.dot_dimension_numbers<[2], [2], [1], [1], [0, 0, 0, 1, 1, 1], [0], [0]>} : vector<2x8x8xf32>, vector<2x8x8xf32>, vector<2x8x8xf32> -> vector<2x8x8xf32>
    "tpu.trace_stop"() : () -> ()
    %cst_33 = arith.constant 0.353553385 : f32
    %128 = vector.broadcast %cst_33 : f32 to vector<2x8x8xf32>
    %129 = arith.mulf %127, %128 : vector<2x8x8xf32>
    %130 = vector.broadcast %55 : vector<2x1x8xf32> to vector<2x8x8xf32>
    %131 = arith.addf %129, %130 : vector<2x8x8xf32>
    %cst_34 = arith.constant dense<0xFF800000> : vector<2x8xf32>
    %132 = vector.multi_reduction <maximumf>, %131, %cst_34 [2] : vector<2x8x8xf32> to vector<2x8xf32>
    %133 = vector.shape_cast %132 : vector<2x8xf32> to vector<2x8x1xf32>
    %134 = vector.broadcast %133 : vector<2x8x1xf32> to vector<2x8x8xf32>
    %135 = arith.subf %131, %134 : vector<2x8x8xf32>
    %136 = math.exp %135 : vector<2x8x8xf32>
    %cst_35 = arith.constant dense<0.000000e+00> : vector<2x8xf32>
    %137 = vector.multi_reduction <add>, %136, %cst_35 [2] : vector<2x8x8xf32> to vector<2x8xf32>
    %138 = vector.shape_cast %137 : vector<2x8xf32> to vector<2x8x1xf32>
    %139 = tpu.reciprocal %138 {approx = true} : vector<2x8x1xf32> -> vector<2x8x1xf32>
    %140 = vector.broadcast %139 : vector<2x8x1xf32> to vector<2x8x8xf32>
    %141 = arith.mulf %136, %140 : vector<2x8x8xf32>
    "tpu.trace_start"() <{level = 10 : i32, message = "bqk,bkd->bqd"}> : () -> ()
    %cst_36 = arith.constant dense<0.000000e+00> : vector<2x8x8xf32>
    %142 = tpu.matmul %141, %126, %cst_36 {dimension_numbers = #tpu.dot_dimension_numbers<[2], [1], [1], [2], [0, 0, 0, 1, 1, 2], [0], [0]>} : vector<2x8x8xf32>, vector<2x8x8xf32>, vector<2x8x8xf32> -> vector<2x8x8xf32>
    "tpu.trace_stop"() : () -> ()
    %143 = tpu.concatenate %85, %104, %123, %142 in 2 : vector<2x8x8xf32>, vector<2x8x8xf32>, vector<2x8x8xf32>, vector<2x8x8xf32> -> vector<2x8x32xf32>
    %144 = vector.shape_cast %143 : vector<2x8x32xf32> to vector<16x32xf32>
    %c128 = arith.constant 128 : index
    %c0_37 = arith.constant 0 : index
    %145 = vector.load %arg1[%c128, %c0_37] : memref<472x128xf32, #tpu.memory_space<vmem>>, vector<32x32xf32>
    %cst_38 = arith.constant dense<0.000000e+00> : vector<16x32xf32>
    %146 = tpu.matmul %144, %145, %cst_38 {dimension_numbers = #tpu.dot_dimension_numbers<[1], [0], [0], [1], [0, 0, 1, 1], [], []>} : vector<16x32xf32>, vector<32x32xf32>, vector<16x32xf32> -> vector<16x32xf32>
    %c257 = arith.constant 257 : index
    %c0_39 = arith.constant 0 : index
    %147 = vector.load %arg1[%c257, %c0_39] : memref<472x128xf32, #tpu.memory_space<vmem>>, vector<1x32xf32>
    %148 = vector.broadcast %147 : vector<1x32xf32> to vector<16x32xf32>
    %149 = arith.addf %146, %148 : vector<16x32xf32>
    %150 = arith.addf %149, %48 : vector<16x32xf32>
    %c258 = arith.constant 258 : index
    %c0_40 = arith.constant 0 : index
    %151 = vector.load %arg1[%c258, %c0_40] : memref<472x128xf32, #tpu.memory_space<vmem>>, vector<1x32xf32>
    %c259 = arith.constant 259 : index
    %c0_41 = arith.constant 0 : index
    %152 = vector.load %arg1[%c259, %c0_41] : memref<472x128xf32, #tpu.memory_space<vmem>>, vector<1x32xf32>
    %cst_42 = arith.constant dense<0.000000e+00> : vector<16xf32>
    %153 = vector.multi_reduction <add>, %150, %cst_42 [1] : vector<16x32xf32> to vector<16xf32>
    %154 = vector.shape_cast %153 : vector<16xf32> to vector<16x1xf32>
    %cst_43 = arith.constant 3.200000e+01 : f32
    %155 = vector.broadcast %cst_43 : f32 to vector<16x1xf32>
    %156 = arith.divf %154, %155 : vector<16x1xf32>
    %157 = vector.broadcast %156 : vector<16x1xf32> to vector<16x32xf32>
    %158 = arith.subf %150, %157 : vector<16x32xf32>
    %159 = vector.broadcast %156 : vector<16x1xf32> to vector<16x32xf32>
    %160 = arith.subf %150, %159 : vector<16x32xf32>
    %161 = arith.mulf %158, %160 : vector<16x32xf32>
    %cst_44 = arith.constant dense<0.000000e+00> : vector<16xf32>
    %162 = vector.multi_reduction <add>, %161, %cst_44 [1] : vector<16x32xf32> to vector<16xf32>
    %163 = vector.shape_cast %162 : vector<16xf32> to vector<16x1xf32>
    %cst_45 = arith.constant 3.200000e+01 : f32
    %164 = vector.broadcast %cst_45 : f32 to vector<16x1xf32>
    %165 = arith.divf %163, %164 : vector<16x1xf32>
    %166 = vector.broadcast %156 : vector<16x1xf32> to vector<16x32xf32>
    %167 = arith.subf %150, %166 : vector<16x32xf32>
    %cst_46 = arith.constant 9.99999996E-13 : f32
    %168 = vector.broadcast %cst_46 : f32 to vector<16x1xf32>
    %169 = arith.addf %165, %168 : vector<16x1xf32>
    %170 = math.rsqrt %169 : vector<16x1xf32>
    %171 = vector.broadcast %170 : vector<16x1xf32> to vector<16x32xf32>
    %172 = arith.mulf %167, %171 : vector<16x32xf32>
    %173 = vector.broadcast %151 : vector<1x32xf32> to vector<16x32xf32>
    %174 = arith.mulf %172, %173 : vector<16x32xf32>
    %175 = vector.broadcast %152 : vector<1x32xf32> to vector<16x32xf32>
    %176 = arith.addf %174, %175 : vector<16x32xf32>
    %c160 = arith.constant 160 : index
    %c0_47 = arith.constant 0 : index
    %177 = vector.load %arg1[%c160, %c0_47] : memref<472x128xf32, #tpu.memory_space<vmem>>, vector<32x64xf32>
    %cst_48 = arith.constant dense<0.000000e+00> : vector<16x64xf32>
    %178 = tpu.matmul %176, %177, %cst_48 {dimension_numbers = #tpu.dot_dimension_numbers<[1], [0], [0], [1], [0, 0, 1, 1], [], []>} : vector<16x32xf32>, vector<32x64xf32>, vector<16x64xf32> -> vector<16x64xf32>
    %c260 = arith.constant 260 : index
    %c0_49 = arith.constant 0 : index
    %179 = vector.load %arg1[%c260, %c0_49] : memref<472x128xf32, #tpu.memory_space<vmem>>, vector<1x64xf32>
    %180 = vector.broadcast %179 : vector<1x64xf32> to vector<16x64xf32>
    %181 = arith.addf %178, %180 : vector<16x64xf32>
    %182 = arith.mulf %181, %181 : vector<16x64xf32>
    %183 = arith.mulf %181, %182 : vector<16x64xf32>
    %cst_50 = arith.constant 4.471500e-02 : f32
    %184 = vector.broadcast %cst_50 : f32 to vector<16x64xf32>
    %185 = arith.mulf %184, %183 : vector<16x64xf32>
    %186 = arith.addf %181, %185 : vector<16x64xf32>
    %cst_51 = arith.constant 0.797884583 : f32
    %187 = vector.broadcast %cst_51 : f32 to vector<16x64xf32>
    %188 = arith.mulf %187, %186 : vector<16x64xf32>
    %189 = math.tanh %188 : vector<16x64xf32>
    %cst_52 = arith.constant 1.000000e+00 : f32
    %190 = vector.broadcast %cst_52 : f32 to vector<16x64xf32>
    %191 = arith.addf %190, %189 : vector<16x64xf32>
    %cst_53 = arith.constant 5.000000e-01 : f32
    %192 = vector.broadcast %cst_53 : f32 to vector<16x64xf32>
    %193 = arith.mulf %192, %191 : vector<16x64xf32>
    %194 = arith.mulf %181, %193 : vector<16x64xf32>
    %c192 = arith.constant 192 : index
    %c0_54 = arith.constant 0 : index
    %195 = vector.load %arg1[%c192, %c0_54] : memref<472x128xf32, #tpu.memory_space<vmem>>, vector<64x32xf32>
    %cst_55 = arith.constant dense<0.000000e+00> : vector<16x32xf32>
    %196 = tpu.matmul %194, %195, %cst_55 {dimension_numbers = #tpu.dot_dimension_numbers<[1], [0], [0], [1], [0, 0, 1, 1], [], []>} : vector<16x64xf32>, vector<64x32xf32>, vector<16x32xf32> -> vector<16x32xf32>
    %c261 = arith.constant 261 : index
    %c0_56 = arith.constant 0 : index
    %197 = vector.load %arg1[%c261, %c0_56] : memref<472x128xf32, #tpu.memory_space<vmem>>, vector<1x32xf32>
    %198 = vector.broadcast %197 : vector<1x32xf32> to vector<16x32xf32>
    %199 = arith.addf %196, %198 : vector<16x32xf32>
    %200 = arith.addf %199, %176 : vector<16x32xf32>
    %c262 = arith.constant 262 : index
    %c0_57 = arith.constant 0 : index
    %201 = vector.load %arg1[%c262, %c0_57] : memref<472x128xf32, #tpu.memory_space<vmem>>, vector<1x32xf32>
    %c263 = arith.constant 263 : index
    %c0_58 = arith.constant 0 : index
    %202 = vector.load %arg1[%c263, %c0_58] : memref<472x128xf32, #tpu.memory_space<vmem>>, vector<1x32xf32>
    %cst_59 = arith.constant dense<0.000000e+00> : vector<16xf32>
    %203 = vector.multi_reduction <add>, %200, %cst_59 [1] : vector<16x32xf32> to vector<16xf32>
    %204 = vector.shape_cast %203 : vector<16xf32> to vector<16x1xf32>
    %cst_60 = arith.constant 3.200000e+01 : f32
    %205 = vector.broadcast %cst_60 : f32 to vector<16x1xf32>
    %206 = arith.divf %204, %205 : vector<16x1xf32>
    %207 = vector.broadcast %206 : vector<16x1xf32> to vector<16x32xf32>
    %208 = arith.subf %200, %207 : vector<16x32xf32>
    %209 = vector.broadcast %206 : vector<16x1xf32> to vector<16x32xf32>
    %210 = arith.subf %200, %209 : vector<16x32xf32>
    %211 = arith.mulf %208, %210 : vector<16x32xf32>
    %cst_61 = arith.constant dense<0.000000e+00> : vector<16xf32>
    %212 = vector.multi_reduction <add>, %211, %cst_61 [1] : vector<16x32xf32> to vector<16xf32>
    %213 = vector.shape_cast %212 : vector<16xf32> to vector<16x1xf32>
    %cst_62 = arith.constant 3.200000e+01 : f32
    %214 = vector.broadcast %cst_62 : f32 to vector<16x1xf32>
    %215 = arith.divf %213, %214 : vector<16x1xf32>
    %216 = vector.broadcast %206 : vector<16x1xf32> to vector<16x32xf32>
    %217 = arith.subf %200, %216 : vector<16x32xf32>
    %cst_63 = arith.constant 9.99999996E-13 : f32
    %218 = vector.broadcast %cst_63 : f32 to vector<16x1xf32>
    %219 = arith.addf %215, %218 : vector<16x1xf32>
    %220 = math.rsqrt %219 : vector<16x1xf32>
    %221 = vector.broadcast %220 : vector<16x1xf32> to vector<16x32xf32>
    %222 = arith.mulf %217, %221 : vector<16x32xf32>
    %223 = vector.broadcast %201 : vector<1x32xf32> to vector<16x32xf32>
    %224 = arith.mulf %222, %223 : vector<16x32xf32>
    %225 = vector.broadcast %202 : vector<1x32xf32> to vector<16x32xf32>
    %226 = arith.addf %224, %225 : vector<16x32xf32>
    %c264 = arith.constant 264 : index
    %c0_64 = arith.constant 0 : index
    %227 = vector.load %arg1[%c264, %c0_64] : memref<472x128xf32, #tpu.memory_space<vmem>>, vector<32x96xf32>
    %cst_65 = arith.constant dense<0.000000e+00> : vector<16x96xf32>
    %228 = tpu.matmul %226, %227, %cst_65 {dimension_numbers = #tpu.dot_dimension_numbers<[1], [0], [0], [1], [0, 0, 1, 1], [], []>} : vector<16x32xf32>, vector<32x96xf32>, vector<16x96xf32> -> vector<16x96xf32>
    %c424 = arith.constant 424 : index
    %c0_66 = arith.constant 0 : index
    %229 = vector.load %arg1[%c424, %c0_66] : memref<472x128xf32, #tpu.memory_space<vmem>>, vector<1x96xf32>
    %230 = vector.broadcast %229 : vector<1x96xf32> to vector<16x96xf32>
    %231 = arith.addf %228, %230 : vector<16x96xf32>
    %232 = vector.extract_strided_slice %231 {offsets = [0, 0], sizes = [16, 32], strides = [1, 1]} : vector<16x96xf32> to vector<16x32xf32>
    %233 = vector.shape_cast %232 : vector<16x32xf32> to vector<2x8x32xf32>
    %234 = vector.extract_strided_slice %231 {offsets = [0, 32], sizes = [16, 32], strides = [1, 1]} : vector<16x96xf32> to vector<16x32xf32>
    %235 = vector.shape_cast %234 : vector<16x32xf32> to vector<2x8x32xf32>
    %236 = vector.extract_strided_slice %231 {offsets = [0, 64], sizes = [16, 32], strides = [1, 1]} : vector<16x96xf32> to vector<16x32xf32>
    %237 = vector.shape_cast %236 : vector<16x32xf32> to vector<2x8x32xf32>
    %238 = vector.extract_strided_slice %233 {offsets = [0, 0, 0], sizes = [2, 8, 8], strides = [1, 1, 1]} : vector<2x8x32xf32> to vector<2x8x8xf32>
    %239 = vector.extract_strided_slice %235 {offsets = [0, 0, 0], sizes = [2, 8, 8], strides = [1, 1, 1]} : vector<2x8x32xf32> to vector<2x8x8xf32>
    %240 = vector.extract_strided_slice %237 {offsets = [0, 0, 0], sizes = [2, 8, 8], strides = [1, 1, 1]} : vector<2x8x32xf32> to vector<2x8x8xf32>
    "tpu.trace_start"() <{level = 10 : i32, message = "bqd,bkd->bqk"}> : () -> ()
    %cst_67 = arith.constant dense<0.000000e+00> : vector<2x8x8xf32>
    %241 = tpu.matmul %238, %239, %cst_67 {dimension_numbers = #tpu.dot_dimension_numbers<[2], [2], [1], [1], [0, 0, 0, 1, 1, 1], [0], [0]>} : vector<2x8x8xf32>, vector<2x8x8xf32>, vector<2x8x8xf32> -> vector<2x8x8xf32>
    "tpu.trace_stop"() : () -> ()
    %cst_68 = arith.constant 0.353553385 : f32
    %242 = vector.broadcast %cst_68 : f32 to vector<2x8x8xf32>
    %243 = arith.mulf %241, %242 : vector<2x8x8xf32>
    %244 = vector.broadcast %55 : vector<2x1x8xf32> to vector<2x8x8xf32>
    %245 = arith.addf %243, %244 : vector<2x8x8xf32>
    %cst_69 = arith.constant dense<0xFF800000> : vector<2x8xf32>
    %246 = vector.multi_reduction <maximumf>, %245, %cst_69 [2] : vector<2x8x8xf32> to vector<2x8xf32>
    %247 = vector.shape_cast %246 : vector<2x8xf32> to vector<2x8x1xf32>
    %248 = vector.broadcast %247 : vector<2x8x1xf32> to vector<2x8x8xf32>
    %249 = arith.subf %245, %248 : vector<2x8x8xf32>
    %250 = math.exp %249 : vector<2x8x8xf32>
    %cst_70 = arith.constant dense<0.000000e+00> : vector<2x8xf32>
    %251 = vector.multi_reduction <add>, %250, %cst_70 [2] : vector<2x8x8xf32> to vector<2x8xf32>
    %252 = vector.shape_cast %251 : vector<2x8xf32> to vector<2x8x1xf32>
    %253 = tpu.reciprocal %252 {approx = true} : vector<2x8x1xf32> -> vector<2x8x1xf32>
    %254 = vector.broadcast %253 : vector<2x8x1xf32> to vector<2x8x8xf32>
    %255 = arith.mulf %250, %254 : vector<2x8x8xf32>
    "tpu.trace_start"() <{level = 10 : i32, message = "bqk,bkd->bqd"}> : () -> ()
    %cst_71 = arith.constant dense<0.000000e+00> : vector<2x8x8xf32>
    %256 = tpu.matmul %255, %240, %cst_71 {dimension_numbers = #tpu.dot_dimension_numbers<[2], [1], [1], [2], [0, 0, 0, 1, 1, 2], [0], [0]>} : vector<2x8x8xf32>, vector<2x8x8xf32>, vector<2x8x8xf32> -> vector<2x8x8xf32>
    "tpu.trace_stop"() : () -> ()
    %257 = vector.extract_strided_slice %233 {offsets = [0, 0, 8], sizes = [2, 8, 8], strides = [1, 1, 1]} : vector<2x8x32xf32> to vector<2x8x8xf32>
    %258 = vector.extract_strided_slice %235 {offsets = [0, 0, 8], sizes = [2, 8, 8], strides = [1, 1, 1]} : vector<2x8x32xf32> to vector<2x8x8xf32>
    %259 = vector.extract_strided_slice %237 {offsets = [0, 0, 8], sizes = [2, 8, 8], strides = [1, 1, 1]} : vector<2x8x32xf32> to vector<2x8x8xf32>
    "tpu.trace_start"() <{level = 10 : i32, message = "bqd,bkd->bqk"}> : () -> ()
    %cst_72 = arith.constant dense<0.000000e+00> : vector<2x8x8xf32>
    %260 = tpu.matmul %257, %258, %cst_72 {dimension_numbers = #tpu.dot_dimension_numbers<[2], [2], [1], [1], [0, 0, 0, 1, 1, 1], [0], [0]>} : vector<2x8x8xf32>, vector<2x8x8xf32>, vector<2x8x8xf32> -> vector<2x8x8xf32>
    "tpu.trace_stop"() : () -> ()
    %cst_73 = arith.constant 0.353553385 : f32
    %261 = vector.broadcast %cst_73 : f32 to vector<2x8x8xf32>
    %262 = arith.mulf %260, %261 : vector<2x8x8xf32>
    %263 = vector.broadcast %55 : vector<2x1x8xf32> to vector<2x8x8xf32>
    %264 = arith.addf %262, %263 : vector<2x8x8xf32>
    %cst_74 = arith.constant dense<0xFF800000> : vector<2x8xf32>
    %265 = vector.multi_reduction <maximumf>, %264, %cst_74 [2] : vector<2x8x8xf32> to vector<2x8xf32>
    %266 = vector.shape_cast %265 : vector<2x8xf32> to vector<2x8x1xf32>
    %267 = vector.broadcast %266 : vector<2x8x1xf32> to vector<2x8x8xf32>
    %268 = arith.subf %264, %267 : vector<2x8x8xf32>
    %269 = math.exp %268 : vector<2x8x8xf32>
    %cst_75 = arith.constant dense<0.000000e+00> : vector<2x8xf32>
    %270 = vector.multi_reduction <add>, %269, %cst_75 [2] : vector<2x8x8xf32> to vector<2x8xf32>
    %271 = vector.shape_cast %270 : vector<2x8xf32> to vector<2x8x1xf32>
    %272 = tpu.reciprocal %271 {approx = true} : vector<2x8x1xf32> -> vector<2x8x1xf32>
    %273 = vector.broadcast %272 : vector<2x8x1xf32> to vector<2x8x8xf32>
    %274 = arith.mulf %269, %273 : vector<2x8x8xf32>
    "tpu.trace_start"() <{level = 10 : i32, message = "bqk,bkd->bqd"}> : () -> ()
    %cst_76 = arith.constant dense<0.000000e+00> : vector<2x8x8xf32>
    %275 = tpu.matmul %274, %259, %cst_76 {dimension_numbers = #tpu.dot_dimension_numbers<[2], [1], [1], [2], [0, 0, 0, 1, 1, 2], [0], [0]>} : vector<2x8x8xf32>, vector<2x8x8xf32>, vector<2x8x8xf32> -> vector<2x8x8xf32>
    "tpu.trace_stop"() : () -> ()
    %276 = vector.extract_strided_slice %233 {offsets = [0, 0, 16], sizes = [2, 8, 8], strides = [1, 1, 1]} : vector<2x8x32xf32> to vector<2x8x8xf32>
    %277 = vector.extract_strided_slice %235 {offsets = [0, 0, 16], sizes = [2, 8, 8], strides = [1, 1, 1]} : vector<2x8x32xf32> to vector<2x8x8xf32>
    %278 = vector.extract_strided_slice %237 {offsets = [0, 0, 16], sizes = [2, 8, 8], strides = [1, 1, 1]} : vector<2x8x32xf32> to vector<2x8x8xf32>
    "tpu.trace_start"() <{level = 10 : i32, message = "bqd,bkd->bqk"}> : () -> ()
    %cst_77 = arith.constant dense<0.000000e+00> : vector<2x8x8xf32>
    %279 = tpu.matmul %276, %277, %cst_77 {dimension_numbers = #tpu.dot_dimension_numbers<[2], [2], [1], [1], [0, 0, 0, 1, 1, 1], [0], [0]>} : vector<2x8x8xf32>, vector<2x8x8xf32>, vector<2x8x8xf32> -> vector<2x8x8xf32>
    "tpu.trace_stop"() : () -> ()
    %cst_78 = arith.constant 0.353553385 : f32
    %280 = vector.broadcast %cst_78 : f32 to vector<2x8x8xf32>
    %281 = arith.mulf %279, %280 : vector<2x8x8xf32>
    %282 = vector.broadcast %55 : vector<2x1x8xf32> to vector<2x8x8xf32>
    %283 = arith.addf %281, %282 : vector<2x8x8xf32>
    %cst_79 = arith.constant dense<0xFF800000> : vector<2x8xf32>
    %284 = vector.multi_reduction <maximumf>, %283, %cst_79 [2] : vector<2x8x8xf32> to vector<2x8xf32>
    %285 = vector.shape_cast %284 : vector<2x8xf32> to vector<2x8x1xf32>
    %286 = vector.broadcast %285 : vector<2x8x1xf32> to vector<2x8x8xf32>
    %287 = arith.subf %283, %286 : vector<2x8x8xf32>
    %288 = math.exp %287 : vector<2x8x8xf32>
    %cst_80 = arith.constant dense<0.000000e+00> : vector<2x8xf32>
    %289 = vector.multi_reduction <add>, %288, %cst_80 [2] : vector<2x8x8xf32> to vector<2x8xf32>
    %290 = vector.shape_cast %289 : vector<2x8xf32> to vector<2x8x1xf32>
    %291 = tpu.reciprocal %290 {approx = true} : vector<2x8x1xf32> -> vector<2x8x1xf32>
    %292 = vector.broadcast %291 : vector<2x8x1xf32> to vector<2x8x8xf32>
    %293 = arith.mulf %288, %292 : vector<2x8x8xf32>
    "tpu.trace_start"() <{level = 10 : i32, message = "bqk,bkd->bqd"}> : () -> ()
    %cst_81 = arith.constant dense<0.000000e+00> : vector<2x8x8xf32>
    %294 = tpu.matmul %293, %278, %cst_81 {dimension_numbers = #tpu.dot_dimension_numbers<[2], [1], [1], [2], [0, 0, 0, 1, 1, 2], [0], [0]>} : vector<2x8x8xf32>, vector<2x8x8xf32>, vector<2x8x8xf32> -> vector<2x8x8xf32>
    "tpu.trace_stop"() : () -> ()
    %295 = vector.extract_strided_slice %233 {offsets = [0, 0, 24], sizes = [2, 8, 8], strides = [1, 1, 1]} : vector<2x8x32xf32> to vector<2x8x8xf32>
    %296 = vector.extract_strided_slice %235 {offsets = [0, 0, 24], sizes = [2, 8, 8], strides = [1, 1, 1]} : vector<2x8x32xf32> to vector<2x8x8xf32>
    %297 = vector.extract_strided_slice %237 {offsets = [0, 0, 24], sizes = [2, 8, 8], strides = [1, 1, 1]} : vector<2x8x32xf32> to vector<2x8x8xf32>
    "tpu.trace_start"() <{level = 10 : i32, message = "bqd,bkd->bqk"}> : () -> ()
    %cst_82 = arith.constant dense<0.000000e+00> : vector<2x8x8xf32>
    %298 = tpu.matmul %295, %296, %cst_82 {dimension_numbers = #tpu.dot_dimension_numbers<[2], [2], [1], [1], [0, 0, 0, 1, 1, 1], [0], [0]>} : vector<2x8x8xf32>, vector<2x8x8xf32>, vector<2x8x8xf32> -> vector<2x8x8xf32>
    "tpu.trace_stop"() : () -> ()
    %cst_83 = arith.constant 0.353553385 : f32
    %299 = vector.broadcast %cst_83 : f32 to vector<2x8x8xf32>
    %300 = arith.mulf %298, %299 : vector<2x8x8xf32>
    %301 = vector.broadcast %55 : vector<2x1x8xf32> to vector<2x8x8xf32>
    %302 = arith.addf %300, %301 : vector<2x8x8xf32>
    %cst_84 = arith.constant dense<0xFF800000> : vector<2x8xf32>
    %303 = vector.multi_reduction <maximumf>, %302, %cst_84 [2] : vector<2x8x8xf32> to vector<2x8xf32>
    %304 = vector.shape_cast %303 : vector<2x8xf32> to vector<2x8x1xf32>
    %305 = vector.broadcast %304 : vector<2x8x1xf32> to vector<2x8x8xf32>
    %306 = arith.subf %302, %305 : vector<2x8x8xf32>
    %307 = math.exp %306 : vector<2x8x8xf32>
    %cst_85 = arith.constant dense<0.000000e+00> : vector<2x8xf32>
    %308 = vector.multi_reduction <add>, %307, %cst_85 [2] : vector<2x8x8xf32> to vector<2x8xf32>
    %309 = vector.shape_cast %308 : vector<2x8xf32> to vector<2x8x1xf32>
    %310 = tpu.reciprocal %309 {approx = true} : vector<2x8x1xf32> -> vector<2x8x1xf32>
    %311 = vector.broadcast %310 : vector<2x8x1xf32> to vector<2x8x8xf32>
    %312 = arith.mulf %307, %311 : vector<2x8x8xf32>
    "tpu.trace_start"() <{level = 10 : i32, message = "bqk,bkd->bqd"}> : () -> ()
    %cst_86 = arith.constant dense<0.000000e+00> : vector<2x8x8xf32>
    %313 = tpu.matmul %312, %297, %cst_86 {dimension_numbers = #tpu.dot_dimension_numbers<[2], [1], [1], [2], [0, 0, 0, 1, 1, 2], [0], [0]>} : vector<2x8x8xf32>, vector<2x8x8xf32>, vector<2x8x8xf32> -> vector<2x8x8xf32>
    "tpu.trace_stop"() : () -> ()
    %314 = tpu.concatenate %256, %275, %294, %313 in 2 : vector<2x8x8xf32>, vector<2x8x8xf32>, vector<2x8x8xf32>, vector<2x8x8xf32> -> vector<2x8x32xf32>
    %315 = vector.shape_cast %314 : vector<2x8x32xf32> to vector<16x32xf32>
    %c296 = arith.constant 296 : index
    %c0_87 = arith.constant 0 : index
    %316 = vector.load %arg1[%c296, %c0_87] : memref<472x128xf32, #tpu.memory_space<vmem>>, vector<32x32xf32>
    %cst_88 = arith.constant dense<0.000000e+00> : vector<16x32xf32>
    %317 = tpu.matmul %315, %316, %cst_88 {dimension_numbers = #tpu.dot_dimension_numbers<[1], [0], [0], [1], [0, 0, 1, 1], [], []>} : vector<16x32xf32>, vector<32x32xf32>, vector<16x32xf32> -> vector<16x32xf32>
    %c425 = arith.constant 425 : index
    %c0_89 = arith.constant 0 : index
    %318 = vector.load %arg1[%c425, %c0_89] : memref<472x128xf32, #tpu.memory_space<vmem>>, vector<1x32xf32>
    %319 = vector.broadcast %318 : vector<1x32xf32> to vector<16x32xf32>
    %320 = arith.addf %317, %319 : vector<16x32xf32>
    %321 = arith.addf %320, %226 : vector<16x32xf32>
    %c426 = arith.constant 426 : index
    %c0_90 = arith.constant 0 : index
    %322 = vector.load %arg1[%c426, %c0_90] : memref<472x128xf32, #tpu.memory_space<vmem>>, vector<1x32xf32>
    %c427 = arith.constant 427 : index
    %c0_91 = arith.constant 0 : index
    %323 = vector.load %arg1[%c427, %c0_91] : memref<472x128xf32, #tpu.memory_space<vmem>>, vector<1x32xf32>
    %cst_92 = arith.constant dense<0.000000e+00> : vector<16xf32>
    %324 = vector.multi_reduction <add>, %321, %cst_92 [1] : vector<16x32xf32> to vector<16xf32>
    %325 = vector.shape_cast %324 : vector<16xf32> to vector<16x1xf32>
    %cst_93 = arith.constant 3.200000e+01 : f32
    %326 = vector.broadcast %cst_93 : f32 to vector<16x1xf32>
    %327 = arith.divf %325, %326 : vector<16x1xf32>
    %328 = vector.broadcast %327 : vector<16x1xf32> to vector<16x32xf32>
    %329 = arith.subf %321, %328 : vector<16x32xf32>
    %330 = vector.broadcast %327 : vector<16x1xf32> to vector<16x32xf32>
    %331 = arith.subf %321, %330 : vector<16x32xf32>
    %332 = arith.mulf %329, %331 : vector<16x32xf32>
    %cst_94 = arith.constant dense<0.000000e+00> : vector<16xf32>
    %333 = vector.multi_reduction <add>, %332, %cst_94 [1] : vector<16x32xf32> to vector<16xf32>
    %334 = vector.shape_cast %333 : vector<16xf32> to vector<16x1xf32>
    %cst_95 = arith.constant 3.200000e+01 : f32
    %335 = vector.broadcast %cst_95 : f32 to vector<16x1xf32>
    %336 = arith.divf %334, %335 : vector<16x1xf32>
    %337 = vector.broadcast %327 : vector<16x1xf32> to vector<16x32xf32>
    %338 = arith.subf %321, %337 : vector<16x32xf32>
    %cst_96 = arith.constant 9.99999996E-13 : f32
    %339 = vector.broadcast %cst_96 : f32 to vector<16x1xf32>
    %340 = arith.addf %336, %339 : vector<16x1xf32>
    %341 = math.rsqrt %340 : vector<16x1xf32>
    %342 = vector.broadcast %341 : vector<16x1xf32> to vector<16x32xf32>
    %343 = arith.mulf %338, %342 : vector<16x32xf32>
    %344 = vector.broadcast %322 : vector<1x32xf32> to vector<16x32xf32>
    %345 = arith.mulf %343, %344 : vector<16x32xf32>
    %346 = vector.broadcast %323 : vector<1x32xf32> to vector<16x32xf32>
    %347 = arith.addf %345, %346 : vector<16x32xf32>
    %c328 = arith.constant 328 : index
    %c0_97 = arith.constant 0 : index
    %348 = vector.load %arg1[%c328, %c0_97] : memref<472x128xf32, #tpu.memory_space<vmem>>, vector<32x64xf32>
    %cst_98 = arith.constant dense<0.000000e+00> : vector<16x64xf32>
    %349 = tpu.matmul %347, %348, %cst_98 {dimension_numbers = #tpu.dot_dimension_numbers<[1], [0], [0], [1], [0, 0, 1, 1], [], []>} : vector<16x32xf32>, vector<32x64xf32>, vector<16x64xf32> -> vector<16x64xf32>
    %c428 = arith.constant 428 : index
    %c0_99 = arith.constant 0 : index
    %350 = vector.load %arg1[%c428, %c0_99] : memref<472x128xf32, #tpu.memory_space<vmem>>, vector<1x64xf32>
    %351 = vector.broadcast %350 : vector<1x64xf32> to vector<16x64xf32>
    %352 = arith.addf %349, %351 : vector<16x64xf32>
    %353 = arith.mulf %352, %352 : vector<16x64xf32>
    %354 = arith.mulf %352, %353 : vector<16x64xf32>
    %cst_100 = arith.constant 4.471500e-02 : f32
    %355 = vector.broadcast %cst_100 : f32 to vector<16x64xf32>
    %356 = arith.mulf %355, %354 : vector<16x64xf32>
    %357 = arith.addf %352, %356 : vector<16x64xf32>
    %cst_101 = arith.constant 0.797884583 : f32
    %358 = vector.broadcast %cst_101 : f32 to vector<16x64xf32>
    %359 = arith.mulf %358, %357 : vector<16x64xf32>
    %360 = math.tanh %359 : vector<16x64xf32>
    %cst_102 = arith.constant 1.000000e+00 : f32
    %361 = vector.broadcast %cst_102 : f32 to vector<16x64xf32>
    %362 = arith.addf %361, %360 : vector<16x64xf32>
    %cst_103 = arith.constant 5.000000e-01 : f32
    %363 = vector.broadcast %cst_103 : f32 to vector<16x64xf32>
    %364 = arith.mulf %363, %362 : vector<16x64xf32>
    %365 = arith.mulf %352, %364 : vector<16x64xf32>
    %c360 = arith.constant 360 : index
    %c0_104 = arith.constant 0 : index
    %366 = vector.load %arg1[%c360, %c0_104] : memref<472x128xf32, #tpu.memory_space<vmem>>, vector<64x32xf32>
    %cst_105 = arith.constant dense<0.000000e+00> : vector<16x32xf32>
    %367 = tpu.matmul %365, %366, %cst_105 {dimension_numbers = #tpu.dot_dimension_numbers<[1], [0], [0], [1], [0, 0, 1, 1], [], []>} : vector<16x64xf32>, vector<64x32xf32>, vector<16x32xf32> -> vector<16x32xf32>
    %c429 = arith.constant 429 : index
    %c0_106 = arith.constant 0 : index
    %368 = vector.load %arg1[%c429, %c0_106] : memref<472x128xf32, #tpu.memory_space<vmem>>, vector<1x32xf32>
    %369 = vector.broadcast %368 : vector<1x32xf32> to vector<16x32xf32>
    %370 = arith.addf %367, %369 : vector<16x32xf32>
    %371 = arith.addf %370, %347 : vector<16x32xf32>
    %c430 = arith.constant 430 : index
    %c0_107 = arith.constant 0 : index
    %372 = vector.load %arg1[%c430, %c0_107] : memref<472x128xf32, #tpu.memory_space<vmem>>, vector<1x32xf32>
    %c431 = arith.constant 431 : index
    %c0_108 = arith.constant 0 : index
    %373 = vector.load %arg1[%c431, %c0_108] : memref<472x128xf32, #tpu.memory_space<vmem>>, vector<1x32xf32>
    %cst_109 = arith.constant dense<0.000000e+00> : vector<16xf32>
    %374 = vector.multi_reduction <add>, %371, %cst_109 [1] : vector<16x32xf32> to vector<16xf32>
    %375 = vector.shape_cast %374 : vector<16xf32> to vector<16x1xf32>
    %cst_110 = arith.constant 3.200000e+01 : f32
    %376 = vector.broadcast %cst_110 : f32 to vector<16x1xf32>
    %377 = arith.divf %375, %376 : vector<16x1xf32>
    %378 = vector.broadcast %377 : vector<16x1xf32> to vector<16x32xf32>
    %379 = arith.subf %371, %378 : vector<16x32xf32>
    %380 = vector.broadcast %377 : vector<16x1xf32> to vector<16x32xf32>
    %381 = arith.subf %371, %380 : vector<16x32xf32>
    %382 = arith.mulf %379, %381 : vector<16x32xf32>
    %cst_111 = arith.constant dense<0.000000e+00> : vector<16xf32>
    %383 = vector.multi_reduction <add>, %382, %cst_111 [1] : vector<16x32xf32> to vector<16xf32>
    %384 = vector.shape_cast %383 : vector<16xf32> to vector<16x1xf32>
    %cst_112 = arith.constant 3.200000e+01 : f32
    %385 = vector.broadcast %cst_112 : f32 to vector<16x1xf32>
    %386 = arith.divf %384, %385 : vector<16x1xf32>
    %387 = vector.broadcast %377 : vector<16x1xf32> to vector<16x32xf32>
    %388 = arith.subf %371, %387 : vector<16x32xf32>
    %cst_113 = arith.constant 9.99999996E-13 : f32
    %389 = vector.broadcast %cst_113 : f32 to vector<16x1xf32>
    %390 = arith.addf %386, %389 : vector<16x1xf32>
    %391 = math.rsqrt %390 : vector<16x1xf32>
    %392 = vector.broadcast %391 : vector<16x1xf32> to vector<16x32xf32>
    %393 = arith.mulf %388, %392 : vector<16x32xf32>
    %394 = vector.broadcast %372 : vector<1x32xf32> to vector<16x32xf32>
    %395 = arith.mulf %393, %394 : vector<16x32xf32>
    %396 = vector.broadcast %373 : vector<1x32xf32> to vector<16x32xf32>
    %397 = arith.addf %395, %396 : vector<16x32xf32>
    %c432 = arith.constant 432 : index
    %c0_114 = arith.constant 0 : index
    %398 = vector.load %arg1[%c432, %c0_114] : memref<472x128xf32, #tpu.memory_space<vmem>>, vector<32x5xf32>
    %cst_115 = arith.constant dense<0.000000e+00> : vector<16x5xf32>
    %399 = tpu.matmul %397, %398, %cst_115 {dimension_numbers = #tpu.dot_dimension_numbers<[1], [0], [0], [1], [0, 0, 1, 1], [], []>} : vector<16x32xf32>, vector<32x5xf32>, vector<16x5xf32> -> vector<16x5xf32>
    %c464 = arith.constant 464 : index
    %c0_116 = arith.constant 0 : index
    %400 = vector.load %arg1[%c464, %c0_116] : memref<472x128xf32, #tpu.memory_space<vmem>>, vector<1x5xf32>
    %401 = vector.broadcast %400 : vector<1x5xf32> to vector<16x5xf32>
    %402 = arith.addf %399, %401 : vector<16x5xf32>
    %c0_117 = arith.constant 0 : index
    %c0_118 = arith.constant 0 : index
    %403 = vector.load %arg4[%c0_117, %c0_118] : memref<16x5xf32, #tpu.memory_space<vmem>>, vector<16x5xf32>
    tpu.vector_store %arg4[%c0_117, %c0_118], %402 {strides = array<i32>} : memref<16x5xf32, #tpu.memory_space<vmem>>, vector<16x5xf32>,
    %cst_119 = arith.constant dense<0xFF800000> : vector<16xf32>
    %404 = vector.multi_reduction <maximumf>, %402, %cst_119 [1] : vector<16x5xf32> to vector<16xf32>
    %405 = vector.shape_cast %404 : vector<16xf32> to vector<16x1xf32>
    %406 = vector.broadcast %405 : vector<16x1xf32> to vector<16x5xf32>
    %407 = arith.subf %402, %406 : vector<16x5xf32>
    %408 = math.exp %407 : vector<16x5xf32>
    %cst_120 = arith.constant dense<0.000000e+00> : vector<16xf32>
    %409 = vector.multi_reduction <add>, %408, %cst_120 [1] : vector<16x5xf32> to vector<16xf32>
    %410 = vector.shape_cast %409 : vector<16xf32> to vector<16x1xf32>
    %411 = math.log %410 : vector<16x1xf32>
    %412 = arith.addf %411, %405 : vector<16x1xf32>
    %413 = tpu.iota {dimensions = array<i32: 1>} : vector<16x5xi32>
    %c0_i32 = arith.constant 0 : i32
    %414 = vector.broadcast %c0_i32 : i32 to vector<16x1xi32>
    %415 = arith.maxsi %4, %414 : vector<16x1xi32>
    %416 = vector.broadcast %415 : vector<16x1xi32> to vector<16x5xi32>
    %417 = arith.cmpi eq, %413, %416 : vector<16x5xi32>
    %418 = arith.extui %417 : vector<16x5xi1> to vector<16x5xi32>
    %419 = arith.sitofp %418 : vector<16x5xi32> to vector<16x5xf32>
    %420 = arith.mulf %402, %419 : vector<16x5xf32>
    %cst_121 = arith.constant dense<0.000000e+00> : vector<16xf32>
    %421 = vector.multi_reduction <add>, %420, %cst_121 [1] : vector<16x5xf32> to vector<16xf32>
    %422 = vector.shape_cast %421 : vector<16xf32> to vector<16x1xf32>
    %423 = arith.subf %412, %422 : vector<16x1xf32>
    %c1_i32 = arith.constant 1 : i32
    %424 = vector.broadcast %c1_i32 : i32 to vector<16x1xi32>
    %425 = arith.cmpi eq, %3, %424 : vector<16x1xi32>
    %c0_i32_122 = arith.constant 0 : i32
    %426 = vector.broadcast %c0_i32_122 : i32 to vector<16x1xi32>
    %427 = arith.cmpi sge, %4, %426 : vector<16x1xi32>
    %428 = arith.andi %425, %427 : vector<16x1xi1>
    %429 = arith.extui %428 : vector<16x1xi1> to vector<16x1xi32>
    %430 = arith.sitofp %429 : vector<16x1xi32> to vector<16x1xf32>
    %431 = arith.mulf %423, %430 : vector<16x1xf32>
    %432 = vector.shape_cast %431 : vector<16x1xf32> to vector<1x16x1xf32>
    %cst_123 = arith.constant dense<0.000000e+00> : vector<1xf32>
    %433 = vector.multi_reduction <add>, %432, %cst_123 [1, 2] : vector<1x16x1xf32> to vector<1xf32>
    %434 = vector.shape_cast %433 : vector<1xf32> to vector<1x1x1xf32>
    %435 = vector.extract %434[0, 0, 0] : f32 from vector<1x1x1xf32>
    %436 = vector.shape_cast %430 : vector<16x1xf32> to vector<1x16x1xf32>
    %cst_124 = arith.constant dense<0.000000e+00> : vector<1xf32>
    %437 = vector.multi_reduction <add>, %436, %cst_124 [1, 2] : vector<1x16x1xf32> to vector<1xf32>
    %438 = vector.shape_cast %437 : vector<1xf32> to vector<1x1x1xf32>
    %439 = vector.extract %438[0, 0, 0] : f32 from vector<1x1x1xf32>
    %cst_125 = arith.constant 1.000000e+00 : f32
    %440 = arith.maximumf %439, %cst_125 : f32
    %441 = arith.divf %435, %440 : f32
    %442 = vector.broadcast %441 : f32 to vector<1x1xf32>
    %c0_126 = arith.constant 0 : index
    %c0_127 = arith.constant 0 : index
    %443 = vector.load %arg5[%c0_126, %c0_127] : memref<1x1xf32, #tpu.memory_space<vmem>>, vector<1x1xf32>
    tpu.vector_store %arg5[%c0_126, %c0_127], %442 {strides = array<i32>} : memref<1x1xf32, #tpu.memory_space<vmem>>, vector<1x1xf32>,
    return
  }
  func.func @transform_0(%arg0: i32) -> (i32, i32) {
    %c0_i32 = arith.constant 0 : i32
    %c0_i32_0 = arith.constant 0 : i32
    %c0_i32_1 = arith.constant 0 : i32
    return %c0_i32, %c0_i32_0 : i32, i32
  }
  func.func @transform_1(%arg0: i32) -> (i32, i32) {
    %c0_i32 = arith.constant 0 : i32
    %c0_i32_0 = arith.constant 0 : i32
    %c0_i32_1 = arith.constant 0 : i32
    return %c0_i32, %c0_i32_0 : i32, i32
  }
  func.func @transform_2(%arg0: i32) -> (i32, i32) {
    %c0_i32 = arith.constant 0 : i32
    %c0_i32_0 = arith.constant 0 : i32
    %c0_i32_1 = arith.constant 0 : i32
    return %c0_i32, %c0_i32_0 : i32, i32
  }
  func.func @transform_3(%arg0: i32) -> (i32, i32) {
    %c0_i32 = arith.constant 0 : i32
    %c0_i32_0 = arith.constant 0 : i32
    %c0_i32_1 = arith.constant 0 : i32
    return %c0_i32, %c0_i32_0 : i32, i32
  }
  func.func @transform_4(%arg0: i32) -> (i32, i32) {
    %c0_i32 = arith.constant 0 : i32
    %c0_i32_0 = arith.constant 0 : i32
    %c0_i32_1 = arith.constant 0 : i32
    return %c0_i32, %c0_i32_0 : i32, i32
  }
}

</mosaic_0001>

<bundles_post_ra>
// kernel: tile.0
= control target key start
LH: loop header
LB: loop body
LE: loop exit
PB: predicated region body
PF: predicated region fallthrough
CT: control target
= control target key end

     0   :  { %s66_s8 = smov 125   ;;  %s67_s9 = smov 123   ;;  %vm7_vm0 = vcmask 7168   ;;  %s117_s0 = inlined_call_operand.vmem [shape: s32[2,8], index: 0, kind: input, shape index: {}]   ;;  %s118_s1 = inlined_call_operand.vmem [shape: s32[16,1], index: 1, kind: output, shape index: {}]  }
   0x1   :  { %v4_v0 = vld [vmem:[%s117_s0] sm:$0x3]  ;;  %s65_s0 = smov 127   ;;  %s68_s10 = smov 126  }
   0x2   :  { %5 = vst [vmem:[#allocation0] sm:$0x3] %v4_v0  ;;  %s69_s11 = smov 124   ;;  %s70_s12 = smov 122  }
   0x3   :  { %s71_s13 = smov 121  }
   0x9   :  { %v9_v1 = vld [vmem:[#allocation0] sm:$0x3]  }
   0xa   :  { %v21_v2 = vld [vmem:[#allocation0] sm:$0x3]   ;;  %10 = vrot.lane.b32.xlu0 %v9_v1, %s65_s0 }
   0xb   :  { %22 = vrot.lane.b32.xlu1 %v21_v2, %s66_s8  ;;  %v33_v3 = vld [vmem:[#allocation0] sm:$0x3]  }
   0xc   :  { %34 = vrot.lane.b32.xlu2 %v33_v3, %s67_s9  ;;  %v15_v4 = vld [vmem:[#allocation0] sm:$0x3]  }
   0xd   :  { %v27_v5 = vld [vmem:[#allocation0] sm:$0x3]  }
   0xe   :  { %v39_v6 = vld [vmem:[#allocation0] sm:$0x3]  }
   0xf   :  { %v45_v7 = vld [vmem:[#allocation0] sm:$0x3]  }
  0x10   :  { %v6_v8 = vld [vmem:[#allocation0] sm:$0x3]  }
  0x11   :  { %8 = vst.msk [vmem:[%s118_s1] ss:$8 sm:$0x3] %vm7_vm0, %v6_v8  }
  0x12   :  { %16 = vrot.lane.b32.xlu0 %v15_v4, %s68_s10 }
  0x13   :  { %28 = vrot.lane.b32.xlu1 %v27_v5, %s69_s11 }
  0x14   :  { %40 = vrot.lane.b32.xlu2 %v39_v6, %s70_s12 }
  0x1a   :  { %46 = vrot.lane.b32.xlu0 %v45_v7, %s71_s13 }
  0x66   :  { %v35_v9 = vpop.permute.xlu2 %34  }
  0x67   :  { %55 = vst.msk [vmem:[%s118_s1 + $0x5] ss:$8 sm:$0x3] %vm7_vm0, %v35_v9  }
  0x6e   :  { %v41_v10 = vpop.permute.xlu2 %40  }
  0x6f   :  { %56 = vst.msk [vmem:[%s118_s1 + $0x6] ss:$8 sm:$0x3] %vm7_vm0, %v41_v10  }
  0x7c   :  { %v11_v11 = vpop.permute.xlu0 %10  }
  0x7d   :  { %v23_v12 = vpop.permute.xlu1 %22   ;;  %51 = vst.msk [vmem:[%s118_s1 + $0x1] ss:$8 sm:$0x3] %vm7_vm0, %v11_v11  }
  0x7e   :  { %53 = vst.msk [vmem:[%s118_s1 + $0x3] ss:$8 sm:$0x3] %vm7_vm0, %v23_v12  }
  0x84   :  { %v17_v13 = vpop.permute.xlu0 %16  }
  0x85   :  { %v29_v14 = vpop.permute.xlu1 %28   ;;  %52 = vst.msk [vmem:[%s118_s1 + $0x2] ss:$8 sm:$0x3] %vm7_vm0, %v17_v13  }
  0x86   :  { %54 = vst.msk [vmem:[%s118_s1 + $0x4] ss:$8 sm:$0x3] %vm7_vm0, %v29_v14  }
  0x8c   :  { %v47_v15 = vpop.permute.xlu0 %46  }
  0x8d   :  { %57 = vst.msk [vmem:[%s118_s1 + $0x7] ss:$8 sm:$0x3] %vm7_vm0, %v47_v15  }

// kernel: custom_bert_forward.1
= control target key start
LH: loop header
LB: loop body
LE: loop exit
PB: predicated region body
PF: predicated region fallthrough
CT: control target
= control target key end

     0   :  { %10 = vsyncpa [#allocation3], 0  ;;  %s2804_s0 = inlined_call_operand.hbm [shape: f32[472,128], index: 0, kind: input, shape index: {}]   ;;  %s2805_s1 = inlined_call_operand.vmem [shape: s32[16,5], index: 1, kind: input, shape index: {}]   ;;  %s2806_s2 = inlined_call_operand.vmem [shape: s32[2,8], index: 2, kind: input, shape index: {}]   ;;  %s2807_s3 = inlined_call_operand.vmem [shape: f32[16,5], index: 3, kind: output, shape index: {0}]   ;;  %s2808_s4 = inlined_call_operand.hbm [shape: f32[1,1], index: 4, kind: output, shape index: {1}]  }
   0x1   :  { %11 = vsyncpa [#allocation4], 0  ;;  %s16_s17 = sshll.u32 %s2804_s0, 4  ;;  %s2357_s18 = smov [#allocation2]   ;;  %s17_s17 = int_to_ptr.hbm [resolvable:$true] %s16_s17 }
   0x2   :  { %s18_s19 = sshll.u32 %s2357_s18, 4  ;;  %s2358_s20 = smov 128   ;;  %s19_s19 = int_to_ptr.vmem [resolvable:$true] %s18_s19 }
   0x3   :  { %s2359_s21 = smov 8  }
   0x4   :  { %24 = dma.hbm_to_vmem [thread:$0]  %s17_s17, 7552, %s19_s19, [#allocation3], %s2358_s20, %s2358_s20, %s2359_s21  }
   0x5   :  { %2353 = dma.done.wait [#allocation3], 7552  }
   0x6   :  { %2354 = vsyncadd [#allocation3], 4294959744  ;;  %v2360_v0 = vmov 0   ;;  %v2361_v1 = vmov 1   ;;  %v33_v2 = vld [vmem:[%s2805_s1] sm:$0xff]  ;;  %v83_v3 = vld [vmem:[#allocation2 + $0x50] sm:$0xff]  ;;  %v35_v20 = vlaneseq }
   0x7   :  { %2153 = vset.pattern.permute.xlu0 %v2360_v0  ;;  %2155 = vset.pattern.permute.xlu1 %v2361_v1  ;;  %v45_v4 = vadd.s32 64, %v33_v2  ;;  %v57_v5 = vadd.s32 80, %v33_v2  ;;  %v82_v6 = vld [vmem:[#allocation2 + $0x48] sm:$0xff]  ;;  %v81_v7 = vld [vmem:[#allocation2 + $0x40] sm:$0xff]  ;;  %v80_v8 = vld [vmem:[#allocation2 + $0x38] sm:$0xff]  ;;  %v2362_v9 = vmov 4  }
   0x8   :  { %2156 = vset.pattern.permute.xlu2 %v2360_v0  ;;  %38 = vperm.xlu0 %2153, %v33_v2   ;;  %v34_v10 = vld [vmem:[%s2805_s1 + $0x8] sm:$0xff]  ;;  %v79_v12 = vld [vmem:[#allocation2 + $0x30] sm:$0xff]  ;;  %v77_v14 = vld [vmem:[#allocation2 + $0x20] sm:$0xff]  ;;  %v2420_v21 = vand.u32 127, %v35_v20  ;;  %vm84_vm4 = vcmask 719872   ;;  %v2363_v24 = vmov 0.0  }
   0x9   :  { %96 = vmatpush.msra.mxu0 %v83_v3  ;;  %60 = vperm.xlu1 %2155, %v57_v5   ;;  %v46_v11 = vadd.s32 64, %v34_v10  ;;  %v78_v13 = vld [vmem:[#allocation2 + $0x28] sm:$0xff]  ;;  %v76_v15 = vld [vmem:[#allocation2 + $0x18] sm:$0xff]  ;;  %v75_v16 = vld [vmem:[#allocation2 + $0x10] sm:$0xff]  ;;  %vm116_vm6 = vcmask 261120   ;;  %v2364_v28 = vmov 32.0  }
   0xa   :  { %v74_v17 = vld [vmem:[#allocation2 + $0x8] sm:$0xff]  ;;  %v73_v18 = vld [vmem:[#allocation2] sm:$0xff]  ;;  %2199 = vrcp.f32 %v2364_v28  ;;  %v58_v29 = vadd.s32 80, %v34_v10  ;;  %v183_v41 = vld [vmem:[#allocation2 + $0x78] sm:$0xff]  ;;  %s2365_s25 = smov 96   ;;  %s2367_s28 = smov 120  }
   0xb   :  { %97 = vmatpush.msra.mxu0 %v82_v6  ;;  %204 = vmatpush.msra.mxu1 %v183_v41  ;;  %v182_v42 = vld [vmem:[#allocation2 + $0x70] sm:$0xff]  ;;  %v181_v43 = vld [vmem:[#allocation2 + $0x68] sm:$0xff]  ;;  %v180_v44 = vld [vmem:[#allocation2 + $0x60] sm:$0xff]  ;;  %s2368_s29 = smov 64   ;;  %s2369_s30 = smov 112  }
   0xc   :  { %v2180_v58 = vld [vmem:[#allocation2 + $0x58] ss:$0 sm:$0xff]  ;;  %v2181_v61 = vld [vmem:[#allocation2 + $0x59] ss:$0 sm:$0xff]  ;;  %v2182_v3 = vld [vmem:[#allocation2 + $0x100] ss:$0 sm:$0xff] }
   0xd   :  { %98 = vmatpush.msra.mxu0 %v81_v7  ;;  %205 = vmatpush.msra.mxu1 %v182_v42  ;;  %s2370_s5 = smov 80   ;;  %s2371_s6 = smov 56  }
   0xe   :  { %s2372_s7 = smov 72   ;;  %s2373_s8 = smov 104  }
   0xf   :  { %99 = vmatpush.msra.mxu0 %v80_v8  ;;  %206 = vmatpush.msra.mxu1 %v181_v43  ;;  %s2374_s9 = smov 40   ;;  %s2375_s10 = smov 48  }
  0x10   :  { %2154 = vset.pattern.permute.xlu0 %v2362_v9  ;;  %v2200_v30 = vpop.eup %2199  ;;  %s2376_s11 = smov 16   ;;  %s2377_s12 = smov 24  }
  0x11   :  { %48 = vperm.xlu0 %2154, %v45_v4   ;;  %100 = vmatpush.msra.mxu0 %v79_v12  ;;  %v124_v31 = vmul.f32 32.0, %v2200_v30  ;;  %vm128_vm7 = vweird.f32 %v2200_v30  ;;  %s2381_s23 = smov 1.0   ;;  %s2382_s24 = smov [#allocation5]  }
  0x12   :  { %207 = vmatpush.msra.mxu1 %v180_v44 }
  0x13   :  { %101 = vmatpush.msra.mxu0 %v78_v13  ;;  %v125_v32 = vsub.f32 1.0, %v124_v31 }
  0x15   :  { %102 = vmatpush.msra.mxu0 %v77_v14  ;;  %v126_v33 = vmul.f32 %v2200_v30, %v125_v32 }
  0x17   :  { %103 = vmatpush.msra.mxu0 %v76_v15  ;;  %v127_v34 = vadd.f32 %v2200_v30, %v126_v33 }
  0x19   :  { %51 = vperm.xlu0 %2154, %v46_v11   ;;  %104 = vmatpush.msra.mxu0 %v75_v16  ;;  %v2428_v35 = vsel %vm128_vm7, %v2200_v30, %v127_v34 }
  0x1b   :  { %105 = vmatpush.msra.mxu0 %v74_v17  ;;  %v174_v17 = vld [vmem:[%s2806_s2] sm:$0x3]  ;;  %s2366_s2 = smov 88  }
  0x1d   :  { %106 = vmatpush.msra.mxu0 %v73_v18 }
  0x21   :  { %2157 = vset.pattern.permute.xlu0 %v2361_v1 }
  0x22   :  { %63 = vperm.xlu0 %2157, %v58_v29  }
  0x7a   :  { %v39_v19 = vpop.permute.xlu0 %38 }
  0x7b   :  { %v61_v22 = vpop.permute.xlu1 %60  ;;  %vm43_vm1 = vcmp.eq.s32.totalorder %v2420_v21, %v39_v19  ;;  %v175_v19 = vcvt.s32.f32 %v174_v17 }
  0x7c   :  { %vm65_vm0 = vcmp.eq.s32.totalorder %v2420_v21, %v61_v22 }
  0x83   :  { %v49_v23 = vpop.permute.xlu0 %48 }
  0x84   :  { %vm53_vm2 = vcmp.eq.s32.totalorder %v2420_v21, %v49_v23  ;;  %v176_v23 = vsub.f32 1.0, %v175_v19 }
  0x85   :  { %vm55_vm3 = vmor %vm43_vm1, %vm53_vm2 }
  0x86   :  { %vm67_vm5 = vmor %vm55_vm3, %vm65_vm0  ;;  %vm218_vm0 = vcmask 64512   ;;  %v177_v28 = vmul.f32 -1e+09, %v176_v23 }
  0x87   :  { %v2047_v25 = vsel %vm67_vm5, 1.0, %v2363_v24  ;;  %vm783_vm5 = vcmask 195584  }
  0x88   :  { %2049 = vmatmul.msk.f32.vlgmr.msra.gmra.mxu0 %vm84_vm4, %v2047_v25  ;;  %v2458_v31 = vperm.slane %v177_v28, 0 }
  0x8b   :  { %v52_v45 = vpop.permute.xlu0 %51 }
  0x8c   :  { %vm54_vm9 = vcmp.eq.s32.totalorder %v2420_v21, %v52_v45 }
  0x94   :  { %v64_v49 = vpop.permute.xlu0 %63 }
  0x95   :  { %vm66_vm8 = vcmp.eq.s32.totalorder %v2420_v21, %v64_v49 }
 0x105   :  { %v108_v26 = vpop.f32.mrf.mxu0 }
 0x106   :  { %v117_v27 = vsel %vm116_vm6, %v108_v26, 0.0 }
 0x107   :  { %118 = vadd.xlane.f32.xlu1 %v117_v27 }
 0x17a   :  { %v119_v36 = vpop.xlane.xlu1 %118 }
 0x17b   :  { %v130_v37 = vmul.f32 %v2428_v35, %v119_v36 }
 0x17d   :  { %v132_v38 = vsub.f32 %v108_v26, %v130_v37 }
 0x17f   :  { %v134_v39 = vmul.f32 %v132_v38, %v132_v38 }
 0x181   :  { %v136_v40 = vsel %vm116_vm6, %v134_v39, 0.0 }
 0x182   :  { %137 = vadd.xlane.f32.xlu2 %v136_v40 }
 0x19a   :  { %41 = vperm.xlu2 %2156, %v34_v10  }
 0x1f5   :  { %v138_v46 = vpop.xlane.xlu2 %137 }
 0x1f6   :  { %v142_v47 = vmul.f32 %v138_v46, %v2428_v35 }
 0x1f8   :  { %v144_v48 = vadd.f32 1e-12, %v142_v47 }
 0x1fa   :  { %2201 = vrsqrt.f32 %v144_v48  ;;  %vm152_vm14 = vweird.f32 %v144_v48 }
 0x1fd   :  { %v42_v50 = vpop.permute.xlu2 %41 }
 0x1fe   :  { %vm44_vm10 = vcmp.eq.s32.totalorder %v2420_v21, %v42_v50 }
 0x1ff   :  { %vm56_vm11 = vmor %vm44_vm10, %vm54_vm9 }
 0x200   :  { %v2202_v51 = vpop.eup %2201  ;;  %vm68_vm12 = vmor %vm56_vm11, %vm66_vm8 }
 0x201   :  { %v147_v52 = vmul.f32 %v2202_v51, %v144_v48  ;;  %v2048_v53 = vsel %vm68_vm12, 1.0, %v2363_v24  ;;  %vm153_vm13 = vweird.f32 %v2202_v51 }
 0x202   :  { %2050 = vmatmul.msk.f32.gmra.mxu0 %vm84_vm4, %v2048_v53  ;;  %vm154_vm15 = vmor %vm152_vm14, %vm153_vm13  ;;  %vm780_vm4 = vcmask 130048   ;;  %vm938_vm13 = vcmask 523264  }
 0x203   :  { %v148_v54 = vmul.f32 %v2202_v51, %v147_v52 }
 0x205   :  { %v149_v55 = vmul.f32 0.5, %v148_v54 }
 0x207   :  { %v150_v56 = vsub.f32 1.5, %v149_v55 }
 0x209   :  { %v151_v57 = vmul.f32 %v2202_v51, %v150_v56 }
 0x20b   :  { %v155_v59 = vsel %vm154_vm15, %v2202_v51, %v151_v57  ;;  %v179_v51 = vrot.slane %v177_v28, 1 }
 0x20c   :  { %v166_v60 = vmul.f32 %v155_v59, %v132_v38 }
 0x20d   :  { %v2483_v52 = vperm.slane %v179_v51, 0 }
 0x20e   :  { %v169_v62 = vmul.f32 %v2180_v58, %v166_v60 }
 0x210   :  { %v2438_v63 = vadd.f32 %v2181_v61, %v169_v62 }
 0x212   :  { %2051 = vmatmul.msk.f32.vlgmr.msra.gmra.mxu1 %vm116_vm6, %v2438_v63 }
 0x27f   :  { %v111_v1 = vpop.f32.mrf.mxu0 }
 0x280   :  { %v120_v2 = vsel %vm116_vm6, %v111_v1, 0.0 }
 0x281   :  { %121 = vadd.xlane.f32.xlu2 %v120_v2 }
 0x28f   :  { %v209_v4 = vpop.f32.mrf.mxu1 }
 0x290   :  { %v2443_v5 = vadd.f32 %v2182_v3, %v209_v4 }
 0x292   :  { %216 = vrot.lane.b32.xlu0 %v2443_v5, %s2365_s25 }
 0x2f4   :  { %v122_v6 = vpop.xlane.xlu2 %121 }
 0x2f5   :  { %v131_v7 = vmul.f32 %v2428_v35, %v122_v6 }
 0x2f7   :  { %v133_v8 = vsub.f32 %v111_v1, %v131_v7 }
 0x2f9   :  { %v135_v9 = vmul.f32 %v133_v8, %v133_v8 }
 0x2fb   :  { %v139_v10 = vsel %vm116_vm6, %v135_v9, 0.0 }
 0x2fc   :  { %140 = vadd.xlane.f32.xlu1 %v139_v10 }
 0x304   :  { %v217_v11 = vpop.permute.xlu0 %216 }
 0x305   :  { %2053 = vmatpush.xpose.msk.msra.mxu2 %vm218_vm0, %v217_v11 }
 0x308   :  { %2054 = vmatmul.msk.f32.vlgmr.msra.gmra.mxu2 %vm218_vm0, %v2443_v5 }
 0x36f   :  { %v141_v12 = vpop.xlane.xlu1 %140 }
 0x370   :  { %v143_v13 = vmul.f32 %v141_v12, %v2428_v35 }
 0x372   :  { %v145_v14 = vadd.f32 1e-12, %v143_v13 }
 0x374   :  { %2203 = vrsqrt.f32 %v145_v14  ;;  %vm162_vm2 = vweird.f32 %v145_v14 }
 0x37a   :  { %v2204_v15 = vpop.eup %2203 }
 0x37b   :  { %v157_v16 = vmul.f32 %v2204_v15, %v145_v14  ;;  %vm163_vm1 = vweird.f32 %v2204_v15 }
 0x37c   :  { %vm164_vm3 = vmor %vm162_vm2, %vm163_vm1 }
 0x37d   :  { %v158_v18 = vmul.f32 %v2204_v15, %v157_v16 }
 0x37f   :  { %v159_v20 = vmul.f32 0.5, %v158_v18 }
 0x381   :  { %v160_v22 = vsub.f32 1.5, %v159_v20 }
 0x383   :  { %v161_v25 = vmul.f32 %v2204_v15, %v160_v22 }
 0x385   :  { %v165_v26 = vsel %vm164_vm3, %v2204_v15, %v161_v25 }
 0x386   :  { %v167_v27 = vmul.f32 %v165_v26, %v133_v8 }
 0x388   :  { %v170_v29 = vmul.f32 %v2180_v58, %v167_v27 }
 0x38a   :  { %v2456_v30 = vadd.f32 %v2181_v61, %v170_v29 }
 0x38b   :  { %v240_v32 = vpop.f32.mrf.mxu2 }
 0x38c   :  { %v270_v33 = vmul.f32 0.35355338, %v240_v32  ;;  %2052 = vmatmul.msk.f32.gmra.mxu1 %vm116_vm6, %v2456_v30 }
 0x38e   :  { %v276_v34 = vadd.f32 %v2458_v31, %v270_v33 }
 0x390   :  { %v278_v36 = vsel %vm218_vm0, %v276_v34, -inf }
 0x391   :  { %279 = vmax.xlane.f32.xlu0 %v278_v36 }
 0x404   :  { %v280_v37 = vpop.xlane.xlu0 %279 }
 0x405   :  { %v284_v38 = vsub.f32 %v276_v34, %v280_v37 }
 0x407   :  { %v286_v39 = vmul.f32 1.442695, %v284_v38 }
 0x409   :  { %2205 = vpow2.f32 %v286_v39  ;;  %v212_v40 = vpop.f32.mrf.mxu1 }
 0x40a   :  { %v2464_v41 = vadd.f32 %v2182_v3, %v212_v40 }
 0x40c   :  { %244 = vrot.lane.b32.xlu1 %v2464_v41, %s2365_s25 }
 0x40f   :  { %v2206_v42 = vpop.eup %2205 }
 0x410   :  { %v290_v43 = vsel %vm218_vm0, %v2206_v42, 0.0 }
 0x411   :  { %291 = vadd.xlane.f32.xlu2 %v290_v43 }
 0x414   :  { %354 = vrot.lane.b32.xlu1 %v2443_v5, %s2366_s2 }
 0x41c   :  { %352 = vrot.lane.b32.xlu1 %v2443_v5, %s2367_s28 }
 0x429   :  { %300 = vrot.lane.b32.xlu2 %v2443_v5, %s2368_s29 }
 0x431   :  { %486 = vrot.lane.b32.xlu2 %v2443_v5, %s2369_s30 }
 0x47e   :  { %v245_v44 = vpop.permute.xlu1 %244 }
 0x47f   :  { %2055 = vmatpush.xpose.msk.msrb.mxu1 %vm218_vm0, %v245_v44 }
 0x482   :  { %2056 = vmatmul.msk.f32.vlgmr.msrb.gmra.mxu1 %vm218_vm0, %v2464_v41 }
 0x484   :  { %v292_v45 = vpop.xlane.xlu2 %291 }
 0x485   :  { %2207 = vrcp.f32 %v292_v45 }
 0x486   :  { %v355_v47 = vpop.permute.xlu1 %354 }
 0x48b   :  { %v2208_v46 = vpop.eup %2207 }
 0x48c   :  { %v301_v48 = vpop.permute.xlu2 %300  ;;  %v298_v49 = vmul.f32 %v2208_v46, %v2206_v42 }
 0x48d   :  { %321 = vmatpush.msrb.mxu2 %v301_v48 }
 0x48e   :  { %2057 = vmatmul.msk.f32.vlgmr.msrb.gmra.mxu2 %vm218_vm0, %v298_v49  ;;  %v353_v50 = vpop.permute.xlu1 %352 }
 0x48f   :  { %2059 = vmatpush.xpose.msk.msra.mxu2 %vm218_vm0, %v355_v47 }
 0x494   :  { %v487_v18 = vpop.permute.xlu2 %486 }
 0x496   :  { %2060 = vmatmul.msk.f32.vlgmr.msra.gmra.mxu2 %vm218_vm0, %v353_v50 }
 0x4ff   :  { %v267_v53 = vpop.f32.mrf.mxu1 }
 0x500   :  { %v271_v54 = vmul.f32 0.35355338, %v267_v53 }
 0x502   :  { %v277_v55 = vadd.f32 %v2483_v52, %v271_v54 }
 0x504   :  { %v281_v56 = vsel %vm218_vm0, %v277_v55, -inf }
 0x505   :  { %282 = vmax.xlane.f32.xlu0 %v281_v56 }
 0x511   :  { %v2487_v57 = vpop.f32.mrf.mxu2 }
 0x519   :  { %326 = vrot.lane.b32.xlu0 %v2464_v41, %s2368_s29  ;;  %v377_v58 = vpop.f32.mrf.mxu2 }
 0x51a   :  { %v408_v59 = vmul.f32 0.35355338, %v377_v58 }
 0x51c   :  { %v410_v60 = vadd.f32 %v408_v59, %v2458_v31 }
 0x51e   :  { %v412_v61 = vsel %vm218_vm0, %v410_v60, -inf }
 0x51f   :  { %413 = vmax.xlane.f32.xlu1 %v412_v61 }
 0x521   :  { %382 = vrot.lane.b32.xlu0 %v2464_v41, %s2366_s2 }
 0x529   :  { %380 = vrot.lane.b32.xlu0 %v2464_v41, %s2367_s28 }
 0x531   :  { %488 = vrot.lane.b32.xlu0 %v2443_v5, %s2370_s5 }
 0x538   :  { %434 = vrot.lane.b32.xlu1 %v2443_v5, %s2371_s6 }
 0x539   :  { %516 = vrot.lane.b32.xlu0 %v2464_v41, %s2370_s5 }
 0x541   :  { %622 = vrot.lane.b32.xlu0 %v2443_v5, %s2372_s7 }
 0x549   :  { %514 = vrot.lane.b32.xlu0 %v2464_v41, %s2369_s30 }
 0x551   :  { %650 = vrot.lane.b32.xlu0 %v2464_v41, %s2372_s7 }
 0x578   :  { %v283_v62 = vpop.xlane.xlu0 %282 }
 0x579   :  { %v285_v1 = vsub.f32 %v277_v55, %v283_v62 }
 0x57b   :  { %v288_v2 = vmul.f32 1.442695, %v285_v1 }
 0x57d   :  { %2209 = vpow2.f32 %v288_v2 }
 0x583   :  { %v2210_v3 = vpop.eup %2209 }
 0x584   :  { %v293_v4 = vsel %vm218_vm0, %v2210_v3, 0.0 }
 0x585   :  { %294 = vadd.xlane.f32.xlu2 %v293_v4 }
 0x58b   :  { %v327_v6 = vpop.permute.xlu0 %326 }
 0x58c   :  { %347 = vmatpush.msra.mxu3 %v327_v6 }
 0x592   :  { %v414_v7 = vpop.xlane.xlu1 %413 }
 0x593   :  { %v418_v8 = vsub.f32 %v410_v60, %v414_v7  ;;  %v383_v9 = vpop.permute.xlu0 %382 }
 0x594   :  { %2061 = vmatpush.xpose.msk.msrb.mxu3 %vm218_vm0, %v383_v9 }
 0x595   :  { %v420_v10 = vmul.f32 1.442695, %v418_v8 }
 0x597   :  { %2211 = vpow2.f32 %v420_v10 }
 0x59b   :  { %v381_v11 = vpop.permute.xlu0 %380 }
 0x59d   :  { %v2212_v12 = vpop.eup %2211  ;;  %620 = vrot.lane.b32.xlu2 %v2443_v5, %s2373_s8 }
 0x59e   :  { %v424_v13 = vsel %vm218_vm0, %v2212_v12, 0.0 }
 0x59f   :  { %425 = vadd.xlane.f32.xlu1 %v424_v13 }
 0x5a3   :  { %v489_v14 = vpop.permute.xlu0 %488 }
 0x5aa   :  { %v435_v15 = vpop.permute.xlu1 %434 }
 0x5ab   :  { %455 = vmatpush.msra.mxu1 %v435_v15  ;;  %v517_v16 = vpop.permute.xlu0 %516 }
 0x5ad   :  { %2067 = vmatpush.xpose.msk.msrb.mxu1 %vm218_vm0, %v517_v16 }
 0x5b3   :  { %v623_v17 = vpop.permute.xlu0 %622 }
 0x5b4   :  { %2071 = vmatpush.xpose.msk.msrb.mxu0 %vm218_vm0, %v623_v17 }
 0x5b8   :  { %648 = vrot.lane.b32.xlu1 %v2464_v41, %s2373_s8 }
 0x5bb   :  { %v515_v25 = vpop.permute.xlu0 %514 }
 0x5c3   :  { %v651_v29 = vpop.permute.xlu0 %650 }
 0x5f8   :  { %v295_v19 = vpop.xlane.xlu2 %294 }
 0x5f9   :  { %2213 = vrcp.f32 %v295_v19 }
 0x5ff   :  { %v2214_v20 = vpop.eup %2213 }
 0x600   :  { %v621_v22 = vpop.permute.xlu2 %620  ;;  %v299_v23 = vmul.f32 %v2214_v20, %v2210_v3 }
 0x601   :  { %2072 = vmatmul.msk.f32.vlgmr.msrb.gmra.mxu0 %vm218_vm0, %v621_v22 }
 0x602   :  { %2058 = vmatmul.msk.f32.vlgmr.msra.gmra.mxu3 %vm218_vm0, %v299_v23 }
 0x603   :  { %2065 = vmatpush.xpose.msk.msra.mxu3 %vm218_vm0, %v489_v14 }
 0x60a   :  { %2062 = vmatmul.msk.f32.vlgmr.msrb.gmra.mxu3 %vm218_vm0, %v381_v11 }
 0x612   :  { %v426_v26 = vpop.xlane.xlu1 %425  ;;  %2066 = vmatmul.msk.f32.vlgmr.msra.gmra.mxu3 %vm218_vm0, %v487_v18 }
 0x613   :  { %2215 = vrcp.f32 %v426_v26  ;;  %v2158_v26 = vpack.i.bf16 %v2464_v41, %v2443_v5 }
 0x619   :  { %v2216_v27 = vpop.eup %2215 }
 0x61a   :  { %v432_v28 = vmul.f32 %v2216_v27, %v2212_v12 }
 0x61c   :  { %2063 = vmatmul.msk.f32.vlgmr.msra.gmra.mxu1 %vm218_vm0, %v432_v28 }
 0x61d   :  { %2073 = vmatpush.xpose.msk.msra.mxu1 %vm218_vm0, %v651_v29 }
 0x624   :  { %2068 = vmatmul.msk.f32.vlgmr.msrb.gmra.mxu1 %vm218_vm0, %v515_v25 }
 0x62a   :  { %v649_v32 = vpop.permute.xlu1 %648 }
 0x62c   :  { %2074 = vmatmul.msk.f32.vlgmr.msra.gmra.mxu1 %vm218_vm0, %v649_v32 }
 0x67e   :  { %v645_v37 = vpop.f32.mrf.mxu0 }
 0x67f   :  { %v676_v39 = vmul.f32 0.35355338, %v645_v37 }
 0x681   :  { %v678_v44 = vadd.f32 %v676_v39, %v2458_v31 }
 0x683   :  { %v680_v48 = vsel %vm218_vm0, %v678_v44, -inf }
 0x685   :  { %v2527_v33 = vpop.f32.mrf.mxu3 }
 0x68d   :  { %v405_v34 = vpop.f32.mrf.mxu3 }
 0x68e   :  { %v409_v36 = vmul.f32 0.35355338, %v405_v34 }
 0x690   :  { %v411_v38 = vadd.f32 %v409_v36, %v2483_v52 }
 0x692   :  { %v415_v40 = vsel %vm218_vm0, %v411_v38, -inf }
 0x693   :  { %416 = vmax.xlane.f32.xlu2 %v415_v40 }
 0x695   :  { %v511_v42 = vpop.f32.mrf.mxu3 }
 0x696   :  { %v542_v43 = vmul.f32 0.35355338, %v511_v42 }
 0x698   :  { %v544_v45 = vadd.f32 %v542_v43, %v2458_v31 }
 0x699   :  { %v457_v46 = vpop.f32.mrf.mxu1 }
 0x69a   :  { %v546_v47 = vsel %vm218_vm0, %v544_v45, -inf }
 0x69b   :  { %547 = vmax.xlane.f32.xlu0 %v546_v47  ;;  %681 = vmax.xlane.f32.xlu2 %v680_v48 }
 0x6a1   :  { %v539_v49 = vpop.f32.mrf.mxu1 }
 0x6a2   :  { %v543_v50 = vmul.f32 0.35355338, %v539_v49 }
 0x6a4   :  { %v545_v51 = vadd.f32 %v543_v50, %v2483_v52 }
 0x6a6   :  { %v549_v53 = vsel %vm218_vm0, %v545_v51, -inf }
 0x6a7   :  { %550 = vmax.xlane.f32.xlu1 %v549_v53 }
 0x6a9   :  { %v673_v54 = vpop.f32.mrf.mxu1 }
 0x6aa   :  { %v677_v55 = vmul.f32 0.35355338, %v673_v54 }
 0x6ac   :  { %v679_v56 = vadd.f32 %v677_v55, %v2483_v52 }
 0x6ae   :  { %v683_v58 = vsel %vm218_vm0, %v679_v56, -inf }
 0x6af   :  { %684 = vmax.xlane.f32.xlu0 %v683_v58  ;;  %v788_v58 = vld [vmem:[#allocation2 + $0x90] sm:$0xff] }
 0x6c3   :  { %460 = vrot.lane.b32.xlu0 %v2464_v41, %s2371_s6 }
 0x6cb   :  { %728 = vrot.lane.b32.xlu0 %v2464_v41, %s2374_s9 }
 0x6d3   :  { %756 = vrot.lane.b32.xlu0 %v457_v46, %s2359_s21 }
 0x706   :  { %v417_v59 = vpop.xlane.xlu2 %416 }
 0x707   :  { %v419_v60 = vsub.f32 %v411_v38, %v417_v59  ;;  %v787_v59 = vld [vmem:[#allocation2 + $0x88] sm:$0xff] }
 0x709   :  { %v422_v61 = vmul.f32 1.442695, %v419_v60  ;;  %v786_v60 = vld [vmem:[#allocation2 + $0x80] sm:$0xff] }
 0x70b   :  { %2217 = vpow2.f32 %v422_v61 }
 0x70e   :  { %v548_v62 = vpop.xlane.xlu0 %547  ;;  %v682_v1 = vpop.xlane.xlu2 %681 }
 0x70f   :  { %v552_v2 = vsub.f32 %v544_v45, %v548_v62  ;;  %v686_v6 = vsub.f32 %v678_v44, %v682_v1 }
 0x711   :  { %v2218_v3 = vpop.eup %2217  ;;  %v554_v4 = vmul.f32 1.442695, %v552_v2  ;;  %v688_v8 = vmul.f32 1.442695, %v686_v6 }
 0x712   :  { %v427_v7 = vsel %vm218_vm0, %v2218_v3, 0.0 }
 0x713   :  { %428 = vadd.xlane.f32.xlu1 %v427_v7  ;;  %2219 = vpow2.f32 %v554_v4 }
 0x714   :  { %2221 = vpow2.f32 %v688_v8 }
 0x719   :  { %v2220_v9 = vpop.eup %2219 }
 0x71a   :  { %v551_v10 = vpop.xlane.xlu1 %550  ;;  %v558_v12 = vsel %vm218_vm0, %v2220_v9, 0.0  ;;  %v2222_v14 = vpop.eup %2221 }
 0x71b   :  { %v553_v11 = vsub.f32 %v545_v51, %v551_v10  ;;  %559 = vadd.xlane.f32.xlu2 %v558_v12  ;;  %v692_v17 = vsel %vm218_vm0, %v2222_v14, 0.0 }
 0x71d   :  { %v556_v13 = vmul.f32 1.442695, %v553_v11 }
 0x71f   :  { %2223 = vpow2.f32 %v556_v13 }
 0x722   :  { %v685_v15 = vpop.xlane.xlu0 %684 }
 0x723   :  { %v687_v16 = vsub.f32 %v679_v56, %v685_v15  ;;  %693 = vadd.xlane.f32.xlu2 %v692_v17  ;;  %v789_v56 = vld [vmem:[#allocation2 + $0x98] sm:$0xff] }
 0x724   :  { %810 = vmatpush.msra.mxu0 %v789_v56 }
 0x725   :  { %v2224_v18 = vpop.eup %2223  ;;  %v690_v19 = vmul.f32 1.442695, %v687_v16 }
 0x726   :  { %v561_v20 = vsel %vm218_vm0, %v2224_v18, 0.0  ;;  %811 = vmatpush.msra.mxu0 %v788_v58 }
 0x727   :  { %2225 = vpow2.f32 %v690_v19  ;;  %562 = vadd.xlane.f32.xlu1 %v561_v20 }
 0x728   :  { %812 = vmatpush.msra.mxu0 %v787_v59 }
 0x72a   :  { %813 = vmatpush.msra.mxu0 %v786_v60 }
 0x72d   :  { %v2226_v22 = vpop.eup %2225 }
 0x72e   :  { %v695_v23 = vsel %vm218_vm0, %v2226_v22, 0.0 }
 0x72f   :  { %696 = vadd.xlane.f32.xlu2 %v695_v23 }
 0x735   :  { %v461_v25 = vpop.permute.xlu0 %460 }
 0x736   :  { %481 = vmatpush.msrb.mxu2 %v461_v25 }
 0x73d   :  { %v729_v44 = vpop.permute.xlu0 %728 }
 0x740   :  { %2159 = vrot.lane.b32.xlu1 %v2158_v26, %s2375_s10 }
 0x745   :  { %v757_v61 = vpop.permute.xlu0 %756 }
 0x746   :  { %v778_v1 = vsel %vm218_vm0, %v2487_v57, %v757_v61  ;;  %v2183_v57 = vld [vmem:[#allocation2 + $0x101] ss:$0 sm:$0xff] }
 0x747   :  { %702 = vrot.lane.b32.xlu2 %v2443_v5, %s2374_s9 }
 0x786   :  { %v429_v27 = vpop.xlane.xlu1 %428 }
 0x787   :  { %2227 = vrcp.f32 %v429_v27 }
 0x78d   :  { %v2228_v28 = vpop.eup %2227 }
 0x78e   :  { %v433_v29 = vmul.f32 %v2228_v28, %v2218_v3  ;;  %v560_v32 = vpop.xlane.xlu2 %559 }
 0x78f   :  { %2229 = vrcp.f32 %v560_v32  ;;  %v877_v32 = vld [vmem:[#allocation2 + $0xb0] sm:$0xff] }
 0x790   :  { %2064 = vmatmul.msk.f32.vlgmr.msrb.gmra.mxu2 %vm218_vm0, %v433_v29 }
 0x795   :  { %v2230_v38 = vpop.eup %2229 }
 0x796   :  { %v694_v34 = vpop.xlane.xlu2 %693  ;;  %v566_v5 = vmul.f32 %v2230_v38, %v2220_v9 }
 0x79a   :  { %v563_v36 = vpop.xlane.xlu1 %562 }
 0x79b   :  { %2231 = vrcp.f32 %v563_v36  ;;  %v875_v36 = vld [vmem:[#allocation2 + $0xa0] sm:$0xff] }
 0x79c   :  { %2233 = vrcp.f32 %v694_v34  ;;  %v876_v34 = vld [vmem:[#allocation2 + $0xa8] sm:$0xff] }
 0x7a1   :  { %v2232_v41 = vpop.eup %2231 }
 0x7a2   :  { %v697_v37 = vpop.xlane.xlu2 %696  ;;  %v567_v43 = vmul.f32 %v2232_v41, %v2224_v18  ;;  %v2234_v46 = vpop.eup %2233 }
 0x7a3   :  { %2235 = vrcp.f32 %v697_v37  ;;  %v700_v48 = vmul.f32 %v2234_v46, %v2222_v14 }
 0x7a9   :  { %v2236_v47 = vpop.eup %2235 }
 0x7aa   :  { %v703_v45 = vpop.permute.xlu2 %702  ;;  %v701_v49 = vmul.f32 %v2236_v47, %v2226_v22 }
 0x7b2   :  { %v2160_v39 = vpop.permute.xlu1 %2159 }
 0x7b3   :  { %v2162_v40 = vunpack.i.h.bf16 %v2160_v39  ;;  %v2161_v42 = vunpack.i.l.bf16 %v2160_v39 }
 0x7b5   :  { %589 = vmatpush.msra.mxu2 %v2161_v42  ;;  %615 = vmatpush.msrb.mxu3 %v2162_v40 }
 0x7b6   :  { %2069 = vmatmul.msk.f32.vlgmr.msra.gmra.mxu2 %vm218_vm0, %v566_v5  ;;  %2070 = vmatmul.msk.f32.vlgmr.msrb.gmra.mxu3 %vm218_vm0, %v567_v43 }
 0x7b7   :  { %723 = vmatpush.msrb.mxu2 %v703_v45  ;;  %749 = vmatpush.msra.mxu3 %v729_v44 }
 0x7be   :  { %2075 = vmatmul.msk.f32.vlgmr.msrb.gmra.mxu2 %vm218_vm0, %v700_v48  ;;  %2076 = vmatmul.msk.f32.vlgmr.msra.gmra.mxu3 %vm218_vm0, %v701_v49 }
 0x813   :  { %v483_v50 = vpop.f32.mrf.mxu2 }
 0x839   :  { %v591_v51 = vpop.f32.mrf.mxu2  ;;  %v617_v53 = vpop.f32.mrf.mxu3 }
 0x83a   :  { %766 = vrot.lane.b32.xlu2 %v617_v53, %s2376_s11  ;;  %764 = vrot.lane.b32.xlu1 %v591_v51, %s2376_s11 }
 0x841   :  { %v725_v54 = vpop.f32.mrf.mxu2  ;;  %v751_v55 = vpop.f32.mrf.mxu3 }
 0x842   :  { %758 = vrot.lane.b32.xlu1 %v483_v50, %s2359_s21  ;;  %772 = vrot.lane.b32.xlu0 %v725_v54, %s2377_s12  ;;  %v2184_v50 = vld [vmem:[#allocation2 + $0x102] ss:$0 sm:$0xff] }
 0x84a   :  { %774 = vrot.lane.b32.xlu0 %v751_v55, %s2377_s12  ;;  %v2185_v55 = vld [vmem:[#allocation2 + $0x103] ss:$0 sm:$0xff] }
 0x894   :  { %v767_v8 = vpop.permute.xlu2 %766 }
 0x8ac   :  { %v765_v62 = vpop.permute.xlu1 %764 }
 0x8ad   :  { %v781_v2 = vsel %vm780_vm4, %v778_v1, %v765_v62 }
 0x8b4   :  { %v773_v3 = vpop.permute.xlu0 %772  ;;  %v759_v6 = vpop.permute.xlu1 %758 }
 0x8b5   :  { %v784_v4 = vsel %vm783_vm5, %v781_v2, %v773_v3  ;;  %v779_v7 = vsel %vm218_vm0, %v2527_v33, %v759_v6  ;;  %v934_v6 = vld [vmem:[#allocation2 + $0xf0] sm:$0xff] }
 0x8b6   :  { %2077 = vmatmul.msk.f32.vlgmr.msra.gmra.mxu0 %vm116_vm6, %v784_v4  ;;  %v782_v10 = vsel %vm780_vm4, %v779_v7, %v767_v8  ;;  %v935_v4 = vld [vmem:[#allocation2 + $0xf8] sm:$0xff]  ;;  %v933_v7 = vld [vmem:[#allocation2 + $0xe8] sm:$0xff]  ;;  %v932_v8 = vld [vmem:[#allocation2 + $0xe0] sm:$0xff] }
 0x8b7   :  { %953 = vmatpush.msra.mxu2 %v935_v4 }
 0x8b9   :  { %954 = vmatpush.msra.mxu2 %v934_v6 }
 0x8bb   :  { %955 = vmatpush.msra.mxu2 %v933_v7 }
 0x8bc   :  { %v775_v9 = vpop.permute.xlu0 %774 }
 0x8bd   :  { %v785_v11 = vsel %vm783_vm5, %v782_v10, %v775_v9  ;;  %956 = vmatpush.msra.mxu2 %v932_v8  ;;  %v931_v9 = vld [vmem:[#allocation2 + $0xd8] sm:$0xff]  ;;  %v930_v10 = vld [vmem:[#allocation2 + $0xd0] sm:$0xff] }
 0x8be   :  { %2078 = vmatmul.msk.f32.gmra.mxu0 %vm116_vm6, %v785_v11  ;;  %v929_v11 = vld [vmem:[#allocation2 + $0xc8] sm:$0xff] }
 0x8bf   :  { %957 = vmatpush.msra.mxu2 %v931_v9 }
 0x8c1   :  { %958 = vmatpush.msra.mxu2 %v930_v10 }
 0x8c3   :  { %959 = vmatpush.msra.mxu2 %v929_v11 }
 0x933   :  { %v815_v12 = vpop.f32.mrf.mxu0 }
 0x934   :  { %v816_v13 = vadd.f32 %v2183_v57, %v815_v12  ;;  %v2186_v12 = vld [vmem:[#allocation2 + $0x104] ss:$0 sm:$0xff] }
 0x936   :  { %v821_v14 = vadd.f32 %v816_v13, %v2438_v63 }
 0x938   :  { %v825_v15 = vsel %vm116_vm6, %v821_v14, 0.0 }
 0x939   :  { %826 = vadd.xlane.f32.xlu1 %v825_v15 }
 0x93b   :  { %v818_v16 = vpop.f32.mrf.mxu0 }
 0x93c   :  { %v819_v17 = vadd.f32 %v2183_v57, %v818_v16  ;;  %v928_v57 = vld [vmem:[#allocation2 + $0xc0] sm:$0xff] }
 0x93d   :  { %960 = vmatpush.msra.mxu2 %v928_v57 }
 0x93e   :  { %v822_v33 = vadd.f32 %v819_v17, %v2456_v30  ;;  %v878_v30 = vld [vmem:[#allocation2 + $0xb8] sm:$0xff] }
 0x93f   :  { %899 = vmatpush.msrb.mxu1 %v878_v30 }
 0x940   :  { %v828_v18 = vsel %vm116_vm6, %v822_v33, 0.0 }
 0x941   :  { %829 = vadd.xlane.f32.xlu2 %v828_v18  ;;  %900 = vmatpush.msrb.mxu1 %v877_v32 }
 0x943   :  { %901 = vmatpush.msrb.mxu1 %v876_v34 }
 0x945   :  { %902 = vmatpush.msrb.mxu1 %v875_v36 }
 0x9ac   :  { %v827_v19 = vpop.xlane.xlu1 %826 }
 0x9ad   :  { %v831_v20 = vmul.f32 %v827_v19, %v2428_v35 }
 0x9af   :  { %v833_v22 = vsub.f32 %v821_v14, %v831_v20 }
 0x9b1   :  { %v835_v23 = vmul.f32 %v833_v22, %v833_v22 }
 0x9b3   :  { %v837_v25 = vsel %vm116_vm6, %v835_v23, 0.0 }
 0x9b4   :  { %838 = vadd.xlane.f32.xlu0 %v837_v25  ;;  %v830_v26 = vpop.xlane.xlu2 %829 }
 0x9b5   :  { %v832_v63 = vmul.f32 %v830_v26, %v2428_v35 }
 0x9b7   :  { %v834_v27 = vsub.f32 %v822_v33, %v832_v63 }
 0x9b9   :  { %v836_v28 = vmul.f32 %v834_v27, %v834_v27 }
 0x9bb   :  { %v840_v29 = vsel %vm116_vm6, %v836_v28, 0.0 }
 0x9bc   :  { %841 = vadd.xlane.f32.xlu1 %v840_v29 }
 0xa27   :  { %v839_v37 = vpop.xlane.xlu0 %838 }
 0xa28   :  { %v843_v38 = vmul.f32 %v839_v37, %v2428_v35 }
 0xa2a   :  { %v845_v41 = vadd.f32 1e-12, %v843_v38  ;;  %v2187_v38 = vld [vmem:[#allocation2 + $0x105] ss:$0 sm:$0xff] }
 0xa2c   :  { %2237 = vrsqrt.f32 %v845_v41  ;;  %vm853_vm8 = vweird.f32 %v845_v41 }
 0xa2f   :  { %v842_v39 = vpop.xlane.xlu1 %841 }
 0xa30   :  { %v844_v40 = vmul.f32 %v842_v39, %v2428_v35 }
 0xa32   :  { %v2238_v42 = vpop.eup %2237  ;;  %v846_v5 = vadd.f32 1e-12, %v844_v40 }
 0xa33   :  { %v848_v43 = vmul.f32 %v2238_v42, %v845_v41  ;;  %vm854_vm7 = vweird.f32 %v2238_v42 }
 0xa34   :  { %2239 = vrsqrt.f32 %v846_v5  ;;  %vm855_vm9 = vmor %vm853_vm8, %vm854_vm7  ;;  %vm863_vm11 = vweird.f32 %v846_v5 }
 0xa35   :  { %v849_v44 = vmul.f32 %v2238_v42, %v848_v43 }
 0xa37   :  { %v850_v45 = vmul.f32 0.5, %v849_v44 }
 0xa39   :  { %v851_v46 = vsub.f32 1.5, %v850_v45 }
 0xa3a   :  { %v2240_v47 = vpop.eup %2239 }
 0xa3b   :  { %v852_v48 = vmul.f32 %v2238_v42, %v851_v46  ;;  %v858_v49 = vmul.f32 %v2240_v47, %v846_v5  ;;  %vm864_vm10 = vweird.f32 %v2240_v47 }
 0xa3c   :  { %vm865_vm12 = vmor %vm863_vm11, %vm864_vm10 }
 0xa3d   :  { %v856_v51 = vsel %vm855_vm9, %v2238_v42, %v852_v48  ;;  %v859_v53 = vmul.f32 %v2240_v47, %v858_v49 }
 0xa3e   :  { %v867_v54 = vmul.f32 %v856_v51, %v833_v22 }
 0xa3f   :  { %v860_v56 = vmul.f32 0.5, %v859_v53 }
 0xa40   :  { %v870_v58 = vmul.f32 %v2184_v50, %v867_v54 }
 0xa41   :  { %v861_v59 = vsub.f32 1.5, %v860_v56 }
 0xa42   :  { %v873_v60 = vadd.f32 %v2185_v55, %v870_v58  ;;  %v1025_v58 = vld [vmem:[#allocation2 + $0x120] sm:$0xff] }
 0xa43   :  { %v862_v61 = vmul.f32 %v2240_v47, %v861_v59  ;;  %1046 = vmatpush.msrb.mxu3 %v1025_v58  ;;  %v1024_v59 = vld [vmem:[#allocation2 + $0x118] sm:$0xff] }
 0xa44   :  { %2079 = vmatmul.msk.f32.vlgmr.msrb.gmra.mxu1 %vm116_vm6, %v873_v60 }
 0xa45   :  { %v866_v62 = vsel %vm865_vm12, %v2240_v47, %v862_v61  ;;  %1047 = vmatpush.msrb.mxu3 %v1024_v59  ;;  %v1022_v61 = vld [vmem:[#allocation2 + $0x108] sm:$0xff] }
 0xa46   :  { %v868_v1 = vmul.f32 %v866_v62, %v834_v27 }
 0xa48   :  { %v871_v2 = vmul.f32 %v2184_v50, %v868_v1 }
 0xa4a   :  { %v874_v3 = vadd.f32 %v2185_v55, %v871_v2 }
 0xa4c   :  { %2080 = vmatmul.msk.f32.gmra.mxu1 %vm116_vm6, %v874_v3 }
 0xac1   :  { %v904_v13 = vpop.f32.mrf.mxu1 }
 0xac2   :  { %v905_v14 = vadd.f32 %v2186_v12, %v904_v13 }
 0xac4   :  { %v910_v15 = vmul.f32 %v905_v14, %v905_v14 }
 0xac6   :  { %v912_v16 = vmul.f32 %v910_v15, %v905_v14 }
 0xac8   :  { %v914_v17 = vmul.f32 0.044715, %v912_v16 }
 0xac9   :  { %v907_v33 = vpop.f32.mrf.mxu1 }
 0xaca   :  { %v916_v18 = vadd.f32 %v914_v17, %v905_v14  ;;  %v908_v19 = vadd.f32 %v2186_v12, %v907_v33  ;;  %v2189_v33 = vld [vmem:[#allocation2 + $0x107] ss:$0 sm:$0xff] }
 0xacc   :  { %v918_v20 = vmul.f32 0.7978846, %v916_v18  ;;  %v911_v22 = vmul.f32 %v908_v19, %v908_v19 }
 0xace   :  { %2241 = vtanh.f32 %v918_v20  ;;  %v913_v23 = vmul.f32 %v911_v22, %v908_v19 }
 0xad0   :  { %v915_v25 = vmul.f32 0.044715, %v913_v23 }
 0xad2   :  { %v917_v26 = vadd.f32 %v915_v25, %v908_v19 }
 0xad4   :  { %v2242_v63 = vpop.eup %2241  ;;  %v919_v27 = vmul.f32 0.7978846, %v917_v26 }
 0xad5   :  { %v922_v28 = vadd.f32 1.0, %v2242_v63 }
 0xad6   :  { %2243 = vtanh.f32 %v919_v27 }
 0xad7   :  { %v924_v29 = vmul.f32 0.5, %v922_v28  ;;  %v2190_v28 = vld [vmem:[#allocation2 + $0x1a8] ss:$0 sm:$0xff] }
 0xad9   :  { %v926_v30 = vmul.f32 %v924_v29, %v905_v14  ;;  %v2188_v14 = vld [vmem:[#allocation2 + $0x106] ss:$0 sm:$0xff] }
 0xadb   :  { %2081 = vmatmul.msk.f32.vlgmr.msra.gmra.mxu2 %vm938_vm13, %v926_v30 }
 0xadc   :  { %v2244_v32 = vpop.eup %2243 }
 0xadd   :  { %v923_v34 = vadd.f32 1.0, %v2244_v32 }
 0xadf   :  { %v925_v36 = vmul.f32 0.5, %v923_v34 }
 0xae1   :  { %v927_v37 = vmul.f32 %v925_v36, %v908_v19 }
 0xae3   :  { %2082 = vmatmul.msk.f32.gmra.mxu2 %vm938_vm13, %v927_v37 }
 0xb5e   :  { %v962_v41 = vpop.f32.mrf.mxu2 }
 0xb5f   :  { %v963_v39 = vadd.f32 %v2187_v38, %v962_v41 }
 0xb61   :  { %v968_v40 = vadd.f32 %v963_v39, %v873_v60  ;;  %v1023_v60 = vld [vmem:[#allocation2 + $0x110] sm:$0xff] }
 0xb62   :  { %1048 = vmatpush.msrb.mxu3 %v1023_v60 }
 0xb63   :  { %v972_v42 = vsel %vm116_vm6, %v968_v40, 0.0 }
 0xb64   :  { %973 = vadd.xlane.f32.xlu2 %v972_v42  ;;  %1049 = vmatpush.msrb.mxu3 %v1022_v61 }
 0xb66   :  { %v965_v5 = vpop.f32.mrf.mxu2 }
 0xb67   :  { %v966_v43 = vadd.f32 %v2187_v38, %v965_v5 }
 0xb69   :  { %v969_v44 = vadd.f32 %v966_v43, %v874_v3 }
 0xb6b   :  { %v975_v45 = vsel %vm116_vm6, %v969_v44, 0.0 }
 0xb6c   :  { %976 = vadd.xlane.f32.xlu0 %v975_v45 }
 0xbd7   :  { %v974_v46 = vpop.xlane.xlu2 %973 }
 0xbd8   :  { %v978_v47 = vmul.f32 %v974_v46, %v2428_v35 }
 0xbda   :  { %v980_v48 = vsub.f32 %v968_v40, %v978_v47 }
 0xbdc   :  { %v982_v49 = vmul.f32 %v980_v48, %v980_v48 }
 0xbde   :  { %v984_v50 = vsel %vm116_vm6, %v982_v49, 0.0 }
 0xbdf   :  { %v977_v51 = vpop.xlane.xlu0 %976  ;;  %985 = vadd.xlane.f32.xlu1 %v984_v50 }
 0xbe0   :  { %v979_v53 = vmul.f32 %v977_v51, %v2428_v35 }
 0xbe2   :  { %v981_v54 = vsub.f32 %v969_v44, %v979_v53 }
 0xbe4   :  { %v983_v55 = vmul.f32 %v981_v54, %v981_v54 }
 0xbe6   :  { %v987_v56 = vsel %vm116_vm6, %v983_v55, 0.0 }
 0xbe7   :  { %988 = vadd.xlane.f32.xlu2 %v987_v56 }
 0xc52   :  { %v986_v62 = vpop.xlane.xlu1 %985 }
 0xc53   :  { %v990_v1 = vmul.f32 %v986_v62, %v2428_v35 }
 0xc55   :  { %v992_v2 = vadd.f32 1e-12, %v990_v1 }
 0xc57   :  { %2245 = vrsqrt.f32 %v992_v2  ;;  %vm1000_vm15 = vweird.f32 %v992_v2 }
 0xc5a   :  { %v989_v3 = vpop.xlane.xlu2 %988 }
 0xc5b   :  { %v991_v4 = vmul.f32 %v989_v3, %v2428_v35 }
 0xc5d   :  { %v2246_v6 = vpop.eup %2245  ;;  %v993_v7 = vadd.f32 1e-12, %v991_v4 }
 0xc5e   :  { %v995_v8 = vmul.f32 %v2246_v6, %v992_v2  ;;  %vm1001_vm14 = vweird.f32 %v2246_v6 }
 0xc5f   :  { %2247 = vrsqrt.f32 %v993_v7  ;;  %vm1002_vm1 = vmor %vm1000_vm15, %vm1001_vm14  ;;  %vm1010_vm3 = vweird.f32 %v993_v7 }
 0xc60   :  { %v996_v9 = vmul.f32 %v2246_v6, %v995_v8 }
 0xc62   :  { %v997_v10 = vmul.f32 0.5, %v996_v9 }
 0xc64   :  { %v998_v11 = vsub.f32 1.5, %v997_v10 }
 0xc65   :  { %v2248_v57 = vpop.eup %2247 }
 0xc66   :  { %v999_v12 = vmul.f32 %v2246_v6, %v998_v11  ;;  %v1005_v13 = vmul.f32 %v2248_v57, %v993_v7  ;;  %vm1011_vm2 = vweird.f32 %v2248_v57 }
 0xc67   :  { %vm1012_vm7 = vmor %vm1010_vm3, %vm1011_vm2  ;;  %vm1891_vm3 = vcmask 39936  }
 0xc68   :  { %v1003_v15 = vsel %vm1002_vm1, %v2246_v6, %v999_v12  ;;  %v1006_v16 = vmul.f32 %v2248_v57, %v1005_v13 }
 0xc69   :  { %v1014_v17 = vmul.f32 %v1003_v15, %v980_v48 }
 0xc6a   :  { %v1007_v18 = vmul.f32 0.5, %v1006_v16 }
 0xc6b   :  { %v1017_v19 = vmul.f32 %v2188_v14, %v1014_v17 }
 0xc6c   :  { %v1008_v20 = vsub.f32 1.5, %v1007_v18 }
 0xc6d   :  { %v2596_v22 = vadd.f32 %v2189_v33, %v1017_v19 }
 0xc6e   :  { %v1009_v23 = vmul.f32 %v2248_v57, %v1008_v20 }
 0xc6f   :  { %2083 = vmatmul.msk.f32.vlgmr.msrb.gmra.mxu3 %vm116_vm6, %v2596_v22 }
 0xc70   :  { %v1013_v25 = vsel %vm1012_vm7, %v2248_v57, %v1009_v23 }
 0xc71   :  { %v1015_v26 = vmul.f32 %v1013_v25, %v981_v54 }
 0xc73   :  { %v1018_v63 = vmul.f32 %v2188_v14, %v1015_v26 }
 0xc75   :  { %v2600_v27 = vadd.f32 %v2189_v33, %v1018_v63 }
 0xc77   :  { %2084 = vmatmul.msk.f32.gmra.mxu3 %vm116_vm6, %v2600_v27 }
 0xcf2   :  { %v1051_v29 = vpop.f32.mrf.mxu3 }
 0xcf3   :  { %v2604_v30 = vadd.f32 %v2190_v28, %v1051_v29 }
 0xcf5   :  { %1191 = vrot.lane.b32.xlu2 %v2604_v30, %s2366_s2  ;;  %1058 = vrot.lane.b32.xlu0 %v2604_v30, %s2365_s25 }
 0xcfa   :  { %v1054_v32 = vpop.f32.mrf.mxu3 }
 0xcfb   :  { %v2610_v34 = vadd.f32 %v2190_v28, %v1054_v32 }
 0xcfd   :  { %1189 = vrot.lane.b32.xlu0 %v2604_v30, %s2367_s28  ;;  %1217 = vrot.lane.b32.xlu2 %v2610_v34, %s2367_s28  ;;  %v2666_v11 = vpack.i.bf16 %v2610_v34, %v2604_v30 }
 0xcfe   :  { %1085 = vrot.lane.b32.xlu1 %v2610_v34, %s2365_s25  ;;  %s2033_s25 = sshll.u32 %s2382_s24, 4  ;;  %s2034_s25 = int_to_ptr.vmem [resolvable:$true] %s2033_s25 }
 0xd05   :  { %1459 = vrot.lane.b32.xlu2 %v2604_v30, %s2372_s7  ;;  %1219 = vrot.lane.b32.xlu0 %v2610_v34, %s2366_s2  ;;  %s2035_s2 = sshll.u32 %s2808_s4, 4  ;;  %s2036_s2 = int_to_ptr.hbm [resolvable:$true] %s2035_s2 }
 0xd06   :  { %1325 = vrot.lane.b32.xlu1 %v2604_v30, %s2370_s5 }
 0xd0d   :  { %1487 = vrot.lane.b32.xlu2 %v2610_v34, %s2372_s7  ;;  %1323 = vrot.lane.b32.xlu0 %v2604_v30, %s2369_s30 }
 0xd0e   :  { %1353 = vrot.lane.b32.xlu1 %v2610_v34, %s2370_s5 }
 0xd15   :  { %1351 = vrot.lane.b32.xlu0 %v2610_v34, %s2369_s30 }
 0xd16   :  { %1457 = vrot.lane.b32.xlu1 %v2604_v30, %s2373_s8 }
 0xd1d   :  { %1485 = vrot.lane.b32.xlu0 %v2610_v34, %s2373_s8 }
 0xd4f   :  { %v1192_v36 = vpop.permute.xlu2 %1191 }
 0xd57   :  { %v1218_v38 = vpop.permute.xlu2 %1217 }
 0xd5f   :  { %v1460_v40 = vpop.permute.xlu2 %1459 }
 0xd67   :  { %v1059_v37 = vpop.permute.xlu0 %1058  ;;  %v1488_v45 = vpop.permute.xlu2 %1487 }
 0xd68   :  { %2085 = vmatpush.xpose.msk.msrb.mxu0 %vm218_vm0, %v1059_v37 }
 0xd6b   :  { %2086 = vmatmul.msk.f32.vlgmr.msrb.gmra.mxu0 %vm218_vm0, %v2604_v30 }
 0xd6f   :  { %v1190_v41 = vpop.permute.xlu0 %1189 }
 0xd70   :  { %v1086_v39 = vpop.permute.xlu1 %1085 }
 0xd71   :  { %2087 = vmatpush.xpose.msk.msra.mxu1 %vm218_vm0, %v1086_v39 }
 0xd74   :  { %2088 = vmatmul.msk.f32.vlgmr.msra.gmra.mxu1 %vm218_vm0, %v2610_v34 }
 0xd75   :  { %2091 = vmatpush.xpose.msk.msrb.mxu1 %vm218_vm0, %v1192_v36 }
 0xd77   :  { %v1220_v42 = vpop.permute.xlu0 %1219 }
 0xd78   :  { %v1326_v5 = vpop.permute.xlu1 %1325  ;;  %2093 = vmatpush.xpose.msk.msrb.mxu2 %vm218_vm0, %v1220_v42 }
 0xd79   :  { %2097 = vmatpush.xpose.msk.msra.mxu1 %vm218_vm0, %v1326_v5 }
 0xd7b   :  { %2094 = vmatmul.msk.f32.vlgmr.msrb.gmra.mxu2 %vm218_vm0, %v1218_v38 }
 0xd7c   :  { %2092 = vmatmul.msk.f32.vlgmr.msrb.gmra.mxu1 %vm218_vm0, %v1190_v41 }
 0xd7d   :  { %2103 = vmatpush.xpose.msk.msrb.mxu1 %vm218_vm0, %v1460_v40 }
 0xd7f   :  { %v1324_v43 = vpop.permute.xlu0 %1323 }
 0xd80   :  { %v1354_v44 = vpop.permute.xlu1 %1353 }
 0xd81   :  { %2099 = vmatpush.xpose.msk.msra.mxu2 %vm218_vm0, %v1354_v44 }
 0xd84   :  { %2098 = vmatmul.msk.f32.vlgmr.msra.gmra.mxu1 %vm218_vm0, %v1324_v43 }
 0xd85   :  { %2105 = vmatpush.xpose.msk.msrb.mxu2 %vm218_vm0, %v1488_v45 }
 0xd87   :  { %v1352_v46 = vpop.permute.xlu0 %1351 }
 0xd88   :  { %2100 = vmatmul.msk.f32.vlgmr.msra.gmra.mxu2 %vm218_vm0, %v1352_v46  ;;  %v1458_v47 = vpop.permute.xlu1 %1457 }
 0xd8c   :  { %2104 = vmatmul.msk.f32.vlgmr.msrb.gmra.mxu1 %vm218_vm0, %v1458_v47 }
 0xd8f   :  { %v1486_v48 = vpop.permute.xlu0 %1485 }
 0xd90   :  { %2106 = vmatmul.msk.f32.vlgmr.msrb.gmra.mxu2 %vm218_vm0, %v1486_v48 }
 0xde8   :  { %v1081_v49 = vpop.f32.mrf.mxu0 }
 0xde9   :  { %v1111_v50 = vmul.f32 0.35355338, %v1081_v49 }
 0xdeb   :  { %v1113_v51 = vadd.f32 %v1111_v50, %v2458_v31 }
 0xded   :  { %v1115_v53 = vsel %vm218_vm0, %v1113_v51, -inf }
 0xdee   :  { %1116 = vmax.xlane.f32.xlu1 %v1115_v53 }
 0xdf1   :  { %v1108_v54 = vpop.f32.mrf.mxu1 }
 0xdf2   :  { %v1112_v18 = vmul.f32 0.35355338, %v1108_v54 }
 0xdf4   :  { %v1114_v20 = vadd.f32 %v1112_v18, %v2483_v52 }
 0xdf6   :  { %v1118_v26 = vsel %vm218_vm0, %v1114_v20, -inf }
 0xdf9   :  { %v1214_v55 = vpop.f32.mrf.mxu1 }
 0xdfa   :  { %v1245_v56 = vmul.f32 0.35355338, %v1214_v55 }
 0xdfc   :  { %v1247_v58 = vadd.f32 %v1245_v56, %v2458_v31 }
 0xdfe   :  { %v1249_v59 = vsel %vm218_vm0, %v1247_v58, -inf  ;;  %v1242_v60 = vpop.f32.mrf.mxu2 }
 0xdff   :  { %1250 = vmax.xlane.f32.xlu2 %v1249_v59  ;;  %v1246_v61 = vmul.f32 0.35355338, %v1242_v60 }
 0xe01   :  { %v1248_v62 = vadd.f32 %v1246_v61, %v2483_v52  ;;  %v1348_v4 = vpop.f32.mrf.mxu1 }
 0xe02   :  { %v1379_v7 = vmul.f32 0.35355338, %v1348_v4 }
 0xe03   :  { %v1252_v1 = vsel %vm218_vm0, %v1248_v62, -inf }
 0xe04   :  { %1253 = vmax.xlane.f32.xlu1 %v1252_v1  ;;  %v1381_v9 = vadd.f32 %v1379_v7, %v2458_v31 }
 0xe06   :  { %v1383_v10 = vsel %vm218_vm0, %v1381_v9, -inf }
 0xe09   :  { %v1482_v23 = vpop.f32.mrf.mxu1 }
 0xe0a   :  { %v1513_v25 = vmul.f32 0.35355338, %v1482_v23 }
 0xe0b   :  { %v1376_v2 = vpop.f32.mrf.mxu2 }
 0xe0c   :  { %v1380_v3 = vmul.f32 0.35355338, %v1376_v2 }
 0xe0e   :  { %v1382_v6 = vadd.f32 %v1380_v3, %v2483_v52 }
 0xe10   :  { %v1386_v8 = vsel %vm218_vm0, %v1382_v6, -inf }
 0xe11   :  { %1387 = vmax.xlane.f32.xlu2 %v1386_v8 }
 0xe13   :  { %v1510_v57 = vpop.f32.mrf.mxu2 }
 0xe14   :  { %v1514_v12 = vmul.f32 0.35355338, %v1510_v57 }
 0xe16   :  { %v2671_v13 = vadd.f32 %v1514_v12, %v2483_v52 }
 0xe18   :  { %v1520_v14 = vsel %vm218_vm0, %v2671_v13, -inf }
 0xe19   :  { %1384 = vmax.xlane.f32.xlu2 %v1383_v10 }
 0xe1d   :  { %2164 = vrot.lane.b32.xlu1 %v2666_v11, %s2368_s29 }
 0xe47   :  { %1521 = vmax.xlane.f32.xlu1 %v1520_v14 }
 0xe60   :  { %1405 = vrot.lane.b32.xlu1 %v2604_v30, %s2375_s10 }
 0xe61   :  { %v1117_v15 = vpop.xlane.xlu1 %1116 }
 0xe62   :  { %v1121_v16 = vsub.f32 %v1113_v51, %v1117_v15 }
 0xe64   :  { %v1123_v17 = vmul.f32 1.442695, %v1121_v16 }
 0xe66   :  { %2249 = vpow2.f32 %v1123_v17 }
 0xe68   :  { %1539 = vrot.lane.b32.xlu1 %v2604_v30, %s2374_s9  ;;  %v1515_v30 = vadd.f32 %v1513_v25, %v2458_v31 }
 0xe6a   :  { %v1517_v37 = vsel %vm218_vm0, %v1515_v30, -inf }
 0xe6c   :  { %v2250_v33 = vpop.eup %2249 }
 0xe6d   :  { %v1127_v19 = vsel %vm218_vm0, %v2250_v33, 0.0 }
 0xe6e   :  { %1128 = vadd.xlane.f32.xlu0 %v1127_v19 }
 0xe70   :  { %1565 = vrot.lane.b32.xlu1 %v2610_v34, %s2374_s9 }
 0xe72   :  { %v1251_v63 = vpop.xlane.xlu2 %1250 }
 0xe73   :  { %v1255_v32 = vsub.f32 %v1247_v58, %v1251_v63 }
 0xe75   :  { %v1257_v38 = vmul.f32 1.442695, %v1255_v32 }
 0xe76   :  { %1119 = vmax.xlane.f32.xlu0 %v1118_v26 }
 0xe77   :  { %v1254_v28 = vpop.xlane.xlu1 %1253 }
 0xe78   :  { %v1256_v29 = vsub.f32 %v1248_v62, %v1254_v28 }
 0xe7a   :  { %v1259_v36 = vmul.f32 1.442695, %v1256_v29 }
 0xe7c   :  { %2251 = vpow2.f32 %v1259_v36 }
 0xe7d   :  { %2253 = vpow2.f32 %v1257_v38 }
 0xe7e   :  { %1518 = vmax.xlane.f32.xlu0 %v1517_v37 }
 0xe82   :  { %v2686_v41 = vpop.eup %2251 }
 0xe83   :  { %v1264_v52 = vsel %vm218_vm0, %v2686_v41, 0.0  ;;  %v2690_v5 = vpop.eup %2253 }
 0xe84   :  { %1265 = vadd.xlane.f32.xlu2 %v1264_v52  ;;  %v1388_v39 = vpop.xlane.xlu2 %1387  ;;  %v1261_v31 = vsel %vm218_vm0, %v2690_v5, 0.0 }
 0xe85   :  { %v1390_v40 = vsub.f32 %v1382_v6, %v1388_v39 }
 0xe87   :  { %v1393_v42 = vmul.f32 1.442695, %v1390_v40 }
 0xe89   :  { %2255 = vpow2.f32 %v1393_v42 }
 0xe8c   :  { %1262 = vadd.xlane.f32.xlu2 %v1261_v31  ;;  %v1385_v43 = vpop.xlane.xlu2 %1384 }
 0xe8d   :  { %v1389_v44 = vsub.f32 %v1381_v9, %v1385_v43 }
 0xe8f   :  { %v1391_v45 = vmul.f32 1.442695, %v1389_v44  ;;  %v2165_v46 = vpop.permute.xlu1 %2164  ;;  %v2694_v47 = vpop.eup %2255 }
 0xe90   :  { %v2167_v48 = vunpack.i.h.bf16 %v2165_v46  ;;  %v2166_v49 = vunpack.i.l.bf16 %v2165_v46  ;;  %v1398_v50 = vsel %vm218_vm0, %v2694_v47, 0.0 }
 0xe91   :  { %2257 = vpow2.f32 %v1391_v45 }
 0xe92   :  { %1158 = vmatpush.msra.mxu3 %v2166_v49  ;;  %1184 = vmatpush.msra.mxu0 %v2167_v48  ;;  %v1624_v49 = vld [vmem:[#allocation2 + $0x140] sm:$0xff] }
 0xe93   :  { %1645 = vmatpush.msra.mxu1 %v1624_v49 }
 0xe94   :  { %1399 = vadd.xlane.f32.xlu2 %v1398_v50  ;;  %v1623_v50 = vld [vmem:[#allocation2 + $0x138] sm:$0xff] }
 0xe95   :  { %1646 = vmatpush.msra.mxu1 %v1623_v50 }
 0xe97   :  { %v2698_v51 = vpop.eup %2257 }
 0xe98   :  { %v1395_v53 = vsel %vm218_vm0, %v2698_v51, 0.0 }
 0xe9c   :  { %1396 = vadd.xlane.f32.xlu2 %v1395_v53  ;;  %v1621_v53 = vld [vmem:[#allocation2 + $0x128] sm:$0xff] }
 0xeba   :  { %v1522_v7 = vpop.xlane.xlu1 %1521 }
 0xebb   :  { %v1524_v8 = vsub.f32 %v2671_v13, %v1522_v7 }
 0xebd   :  { %v1527_v9 = vmul.f32 1.442695, %v1524_v8 }
 0xed2   :  { %v1406_v17 = vpop.permute.xlu1 %1405 }
 0xeda   :  { %v1540_v13 = vpop.permute.xlu1 %1539 }
 0xee1   :  { %v1129_v54 = vpop.xlane.xlu0 %1128 }
 0xee2   :  { %2259 = vrcp.f32 %v1129_v54 }
 0xee8   :  { %v2260_v55 = vpop.eup %2259 }
 0xee9   :  { %v1135_v56 = vmul.f32 %v2260_v55, %v2250_v33  ;;  %v1120_v58 = vpop.xlane.xlu0 %1119 }
 0xeea   :  { %v1122_v59 = vsub.f32 %v1114_v20, %v1120_v58 }
 0xeeb   :  { %2089 = vmatmul.msk.f32.vlgmr.msra.gmra.mxu3 %vm218_vm0, %v1135_v56 }
 0xeec   :  { %v1125_v60 = vmul.f32 1.442695, %v1122_v59 }
 0xeee   :  { %2261 = vpow2.f32 %v1125_v60 }
 0xef1   :  { %v1519_v61 = vpop.xlane.xlu0 %1518 }
 0xef2   :  { %v1523_v62 = vsub.f32 %v1515_v30, %v1519_v61  ;;  %v1566_v30 = vpop.permute.xlu1 %1565 }
 0xef4   :  { %v2262_v1 = vpop.eup %2261  ;;  %v1525_v2 = vmul.f32 1.442695, %v1523_v62 }
 0xef5   :  { %v1130_v3 = vsel %vm218_vm0, %v2262_v1, 0.0 }
 0xef6   :  { %2263 = vpow2.f32 %v1525_v2  ;;  %1131 = vadd.xlane.f32.xlu0 %v1130_v3 }
 0xef7   :  { %2265 = vpow2.f32 %v1527_v9  ;;  %v1266_v12 = vpop.xlane.xlu2 %1265 }
 0xefc   :  { %v2264_v4 = vpop.eup %2263 }
 0xefd   :  { %v1529_v6 = vsel %vm218_vm0, %v2264_v4, 0.0  ;;  %v2266_v10 = vpop.eup %2265 }
 0xefe   :  { %1530 = vadd.xlane.f32.xlu2 %v1529_v6  ;;  %v1532_v57 = vsel %vm218_vm0, %v2266_v10, 0.0  ;;  %v2191_v6 = vld [vmem:[#allocation2 + $0x1a9] ss:$0 sm:$0xff] }
 0xeff   :  { %v1263_v14 = vpop.xlane.xlu2 %1262 }
 0xf07   :  { %v1400_v15 = vpop.xlane.xlu2 %1399 }
 0xf0a   :  { %2169 = vrot.lane.b32.xlu0 %v2666_v11, %s2371_s6 }
 0xf0f   :  { %v1397_v33 = vpop.xlane.xlu2 %1396 }
 0xf16   :  { %1431 = vrot.lane.b32.xlu2 %v2610_v34, %s2375_s10 }
 0xf34   :  { %1533 = vadd.xlane.f32.xlu0 %v1532_v57 }
 0xf69   :  { %v1132_v16 = vpop.xlane.xlu0 %1131 }
 0xf6a   :  { %2267 = vrcp.f32 %v1132_v16 }
 0xf6b   :  { %2269 = vrcp.f32 %v1266_v12 }
 0xf6c   :  { %2271 = vrcp.f32 %v1263_v14 }
 0xf6d   :  { %2273 = vrcp.f32 %v1400_v15 }
 0xf6e   :  { %2275 = vrcp.f32 %v1397_v33 }
 0xf70   :  { %v2268_v11 = vpop.eup %2267 }
 0xf71   :  { %v1136_v18 = vmul.f32 %v2268_v11, %v2262_v1  ;;  %v1531_v34 = vpop.xlane.xlu2 %1530  ;;  %v2270_v19 = vpop.eup %2269 }
 0xf72   :  { %v2272_v20 = vpop.eup %2271  ;;  %v1270_v63 = vmul.f32 %v2270_v19, %v2686_v41  ;;  %2277 = vrcp.f32 %v1531_v34 }
 0xf73   :  { %2090 = vmatmul.msk.f32.vlgmr.msra.gmra.mxu0 %vm218_vm0, %v1136_v18  ;;  %v1269_v28 = vmul.f32 %v2272_v20, %v2690_v5  ;;  %v2274_v32 = vpop.eup %2273  ;;  %v1160_v5 = vpop.f32.mrf.mxu3 }
 0xf74   :  { %v2276_v36 = vpop.eup %2275  ;;  %v1404_v37 = vmul.f32 %v2274_v32, %v2694_v47 }
 0xf75   :  { %v1403_v38 = vmul.f32 %v2276_v36, %v2698_v51  ;;  %v1622_v51 = vld [vmem:[#allocation2 + $0x130] sm:$0xff] }
 0xf76   :  { %1647 = vmatpush.msra.mxu1 %v1622_v51 }
 0xf78   :  { %v2278_v41 = vpop.eup %2277  ;;  %1648 = vmatpush.msra.mxu1 %v1621_v53 }
 0xf79   :  { %v1432_v29 = vpop.permute.xlu2 %1431  ;;  %v1537_v52 = vmul.f32 %v2278_v41, %v2264_v4 }
 0xf7c   :  { %v2170_v23 = vpop.permute.xlu0 %2169 }
 0xf7d   :  { %v2172_v25 = vunpack.i.h.bf16 %v2170_v23  ;;  %v2171_v26 = vunpack.i.l.bf16 %v2170_v23  ;;  %v1712_v23 = vld [vmem:[#allocation2 + $0x158] sm:$0xff] }
 0xf7f   :  { %1292 = vmatpush.msrb.mxu3 %v2171_v26  ;;  %1318 = vmatpush.msrb.mxu0 %v2172_v25  ;;  %v1711_v25 = vld [vmem:[#allocation2 + $0x150] sm:$0xff]  ;;  %v1710_v26 = vld [vmem:[#allocation2 + $0x148] sm:$0xff] }
 0xf80   :  { %2095 = vmatmul.msk.f32.vlgmr.msrb.gmra.mxu3 %vm218_vm0, %v1269_v28  ;;  %2096 = vmatmul.msk.f32.vlgmr.msrb.gmra.mxu0 %vm218_vm0, %v1270_v63 }
 0xf81   :  { %1426 = vmatpush.msra.mxu3 %v1406_v17  ;;  %1452 = vmatpush.msra.mxu0 %v1432_v29 }
 0xf83   :  { %1560 = vmatpush.msrb.mxu3 %v1540_v13  ;;  %1586 = vmatpush.msrb.mxu0 %v1566_v30 }
 0xf88   :  { %2101 = vmatmul.msk.f32.vlgmr.msra.gmra.mxu3 %vm218_vm0, %v1403_v38  ;;  %2102 = vmatmul.msk.f32.vlgmr.msra.gmra.mxu0 %vm218_vm0, %v1404_v37 }
 0xf90   :  { %2107 = vmatmul.msk.f32.vlgmr.msrb.gmra.mxu3 %vm218_vm0, %v1537_v52  ;;  %v2192_v52 = vld [vmem:[#allocation2 + $0x1aa] ss:$0 sm:$0xff] }
 0xfa7   :  { %v1534_v39 = vpop.xlane.xlu0 %1533 }
 0xfa8   :  { %2279 = vrcp.f32 %v1534_v39 }
 0xfae   :  { %v2280_v40 = vpop.eup %2279 }
 0xfaf   :  { %v1538_v42 = vmul.f32 %v2280_v40, %v2266_v10 }
 0xfb1   :  { %2108 = vmatmul.msk.f32.vlgmr.msrb.gmra.mxu0 %vm218_vm0, %v1538_v42  ;;  %v2193_v42 = vld [vmem:[#allocation2 + $0x1ab] ss:$0 sm:$0xff] }
 0xff0   :  { %v1186_v43 = vpop.f32.mrf.mxu0 }
 0xffd   :  { %v1320_v45 = vpop.f32.mrf.mxu0 }
0x1003   :  { %v1294_v31 = vpop.f32.mrf.mxu3 }
0x1004   :  { %1593 = vrot.lane.b32.xlu1 %v1294_v31, %s2359_s21 }
0x1005   :  { %v1454_v47 = vpop.f32.mrf.mxu0 }
0x100b   :  { %v1428_v44 = vpop.f32.mrf.mxu3 }
0x100c   :  { %1601 = vrot.lane.b32.xlu1 %v1428_v44, %s2376_s11 }
0x1013   :  { %v1562_v46 = vpop.f32.mrf.mxu3 }
0x1014   :  { %1595 = vrot.lane.b32.xlu1 %v1320_v45, %s2359_s21  ;;  %1609 = vrot.lane.b32.xlu2 %v1562_v46, %s2377_s12 }
0x101c   :  { %1603 = vrot.lane.b32.xlu2 %v1454_v47, %s2376_s11 }
0x102e   :  { %v1588_v48 = vpop.f32.mrf.mxu0 }
0x102f   :  { %1611 = vrot.lane.b32.xlu1 %v1588_v48, %s2377_s12 }
0x106e   :  { %v1610_v58 = vpop.permute.xlu2 %1609 }
0x1076   :  { %v1594_v54 = vpop.permute.xlu1 %1593  ;;  %v1604_v1 = vpop.permute.xlu2 %1603 }
0x1077   :  { %v1615_v55 = vsel %vm218_vm0, %v1160_v5, %v1594_v54 }
0x107e   :  { %v1602_v56 = vpop.permute.xlu1 %1601 }
0x107f   :  { %v1617_v59 = vsel %vm780_vm4, %v1615_v55, %v1602_v56 }
0x1080   :  { %v1619_v60 = vsel %vm783_vm5, %v1617_v59, %v1610_v58  ;;  %v1770_v58 = vld [vmem:[#allocation2 + $0x1a0] sm:$0xff]  ;;  %v1769_v59 = vld [vmem:[#allocation2 + $0x198] sm:$0xff] }
0x1081   :  { %2109 = vmatmul.msk.f32.vlgmr.msra.gmra.mxu1 %vm116_vm6, %v1619_v60  ;;  %1787 = vmatpush.msra.mxu3 %v1770_v58  ;;  %v1768_v60 = vld [vmem:[#allocation2 + $0x190] sm:$0xff] }
0x1083   :  { %1788 = vmatpush.msra.mxu3 %v1769_v59 }
0x1085   :  { %1789 = vmatpush.msra.mxu3 %v1768_v60 }
0x1086   :  { %v1596_v61 = vpop.permute.xlu1 %1595 }
0x1087   :  { %v1616_v62 = vsel %vm218_vm0, %v1186_v43, %v1596_v61  ;;  %v1767_v61 = vld [vmem:[#allocation2 + $0x188] sm:$0xff] }
0x1088   :  { %v1618_v3 = vsel %vm780_vm4, %v1616_v62, %v1604_v1  ;;  %1790 = vmatpush.msra.mxu3 %v1767_v61  ;;  %v1766_v62 = vld [vmem:[#allocation2 + $0x180] sm:$0xff]  ;;  %v1765_v1 = vld [vmem:[#allocation2 + $0x178] sm:$0xff] }
0x108a   :  { %1791 = vmatpush.msra.mxu3 %v1766_v62 }
0x108c   :  { %1792 = vmatpush.msra.mxu3 %v1765_v1 }
0x10a1   :  { %v1612_v2 = vpop.permute.xlu1 %1611 }
0x10a2   :  { %v1620_v4 = vsel %vm783_vm5, %v1618_v3, %v1612_v2  ;;  %v1764_v2 = vld [vmem:[#allocation2 + $0x170] sm:$0xff]  ;;  %v1763_v3 = vld [vmem:[#allocation2 + $0x168] sm:$0xff] }
0x10a3   :  { %2110 = vmatmul.msk.f32.gmra.mxu1 %vm116_vm6, %v1620_v4  ;;  %1793 = vmatpush.msra.mxu3 %v1764_v2  ;;  %v2194_v4 = vld [vmem:[#allocation2 + $0x1ac] ss:$0 sm:$0xff]  ;;  %v2196_v2 = vld [vmem:[#allocation2 + $0x1ae] ss:$0 sm:$0xff] }
0x10a5   :  { %1794 = vmatpush.msra.mxu3 %v1763_v3 }
0x10fe   :  { %v1650_v7 = vpop.f32.mrf.mxu1 }
0x10ff   :  { %v1651_v8 = vadd.f32 %v2191_v6, %v1650_v7 }
0x1101   :  { %v1656_v9 = vadd.f32 %v1651_v8, %v2596_v22 }
0x1103   :  { %v1660_v10 = vsel %vm116_vm6, %v1656_v9, 0.0 }
0x1104   :  { %1661 = vadd.xlane.f32.xlu0 %v1660_v10 }
0x1120   :  { %v1653_v57 = vpop.f32.mrf.mxu1 }
0x1121   :  { %v1654_v12 = vadd.f32 %v2191_v6, %v1653_v57 }
0x1123   :  { %v1657_v14 = vadd.f32 %v1654_v12, %v2600_v27  ;;  %v1713_v27 = vld [vmem:[#allocation2 + $0x160] sm:$0xff] }
0x1124   :  { %1734 = vmatpush.msra.mxu2 %v1713_v27 }
0x1125   :  { %v1663_v15 = vsel %vm116_vm6, %v1657_v14, 0.0 }
0x1126   :  { %1664 = vadd.xlane.f32.xlu2 %v1663_v15  ;;  %1735 = vmatpush.msra.mxu2 %v1712_v23 }
0x1128   :  { %1736 = vmatpush.msra.mxu2 %v1711_v25 }
0x112a   :  { %1737 = vmatpush.msra.mxu2 %v1710_v26  ;;  %v2195_v26 = vld [vmem:[#allocation2 + $0x1ad] ss:$0 sm:$0xff] }
0x1177   :  { %v1662_v16 = vpop.xlane.xlu0 %1661 }
0x1178   :  { %v1666_v17 = vmul.f32 %v1662_v16, %v2428_v35 }
0x117a   :  { %v1668_v33 = vsub.f32 %v1656_v9, %v1666_v17 }
0x117c   :  { %v1670_v11 = vmul.f32 %v1668_v33, %v1668_v33 }
0x117e   :  { %v1672_v18 = vsel %vm116_vm6, %v1670_v11, 0.0 }
0x117f   :  { %1673 = vadd.xlane.f32.xlu1 %v1672_v18 }
0x1199   :  { %v1665_v34 = vpop.xlane.xlu2 %1664 }
0x119a   :  { %v1667_v22 = vmul.f32 %v1665_v34, %v2428_v35 }
0x119c   :  { %v1669_v13 = vsub.f32 %v1657_v14, %v1667_v22 }
0x119e   :  { %v1671_v19 = vmul.f32 %v1669_v13, %v1669_v13 }
0x11a0   :  { %v1675_v20 = vsel %vm116_vm6, %v1671_v19, 0.0 }
0x11a1   :  { %1676 = vadd.xlane.f32.xlu0 %v1675_v20 }
0x11f2   :  { %v1674_v63 = vpop.xlane.xlu1 %1673 }
0x11f3   :  { %v1678_v28 = vmul.f32 %v1674_v63, %v2428_v35 }
0x11f5   :  { %v1680_v29 = vadd.f32 1e-12, %v1678_v28 }
0x11f7   :  { %2281 = vrsqrt.f32 %v1680_v29  ;;  %vm1688_vm4 = vweird.f32 %v1680_v29 }
0x11fd   :  { %v2282_v30 = vpop.eup %2281 }
0x11fe   :  { %v1683_v32 = vmul.f32 %v2282_v30, %v1680_v29  ;;  %vm1689_vm0 = vweird.f32 %v2282_v30 }
0x11ff   :  { %vm1690_vm5 = vmor %vm1688_vm4, %vm1689_vm0 }
0x1200   :  { %v1684_v36 = vmul.f32 %v2282_v30, %v1683_v32 }
0x1202   :  { %v1685_v37 = vmul.f32 0.5, %v1684_v36 }
0x1204   :  { %v1686_v38 = vsub.f32 1.5, %v1685_v37 }
0x1206   :  { %v1687_v41 = vmul.f32 %v2282_v30, %v1686_v38 }
0x1208   :  { %v1691_v39 = vsel %vm1690_vm5, %v2282_v30, %v1687_v41 }
0x1209   :  { %v1702_v40 = vmul.f32 %v1691_v39, %v1668_v33 }
0x120b   :  { %v1705_v5 = vmul.f32 %v2192_v52, %v1702_v40 }
0x120d   :  { %v2745_v31 = vadd.f32 %v2193_v42, %v1705_v5 }
0x120f   :  { %2111 = vmatmul.msk.f32.vlgmr.msra.gmra.mxu2 %vm116_vm6, %v2745_v31 }
0x1214   :  { %v1677_v43 = vpop.xlane.xlu0 %1676 }
0x1215   :  { %v1679_v44 = vmul.f32 %v1677_v43, %v2428_v35 }
0x1217   :  { %v1681_v45 = vadd.f32 1e-12, %v1679_v44 }
0x1219   :  { %2283 = vrsqrt.f32 %v1681_v45  ;;  %vm1698_vm9 = vweird.f32 %v1681_v45 }
0x121f   :  { %v2284_v46 = vpop.eup %2283 }
0x1220   :  { %v1693_v47 = vmul.f32 %v2284_v46, %v1681_v45  ;;  %vm1699_vm8 = vweird.f32 %v2284_v46 }
0x1221   :  { %vm1700_vm10 = vmor %vm1698_vm9, %vm1699_vm8 }
0x1222   :  { %v1694_v48 = vmul.f32 %v2284_v46, %v1693_v47  ;;  %v1858_v47 = vld [vmem:[#allocation2 + $0x1c0] sm:$0xff] }
0x1224   :  { %v1695_v49 = vmul.f32 0.5, %v1694_v48  ;;  %v1857_v48 = vld [vmem:[#allocation2 + $0x1b8] sm:$0xff] }
0x1226   :  { %v1696_v50 = vsub.f32 1.5, %v1695_v49  ;;  %v1856_v49 = vld [vmem:[#allocation2 + $0x1b0] sm:$0xff] }
0x1228   :  { %v1697_v51 = vmul.f32 %v2284_v46, %v1696_v50 }
0x122a   :  { %v1701_v53 = vsel %vm1700_vm10, %v2284_v46, %v1697_v51  ;;  %v1859_v46 = vld [vmem:[#allocation2 + $0x1c8] sm:$0xff] }
0x122b   :  { %v1703_v54 = vmul.f32 %v1701_v53, %v1669_v13  ;;  %1880 = vmatpush.msra.mxu0 %v1859_v46 }
0x122d   :  { %v1706_v55 = vmul.f32 %v2192_v52, %v1703_v54  ;;  %1881 = vmatpush.msra.mxu0 %v1858_v47  ;;  %v2764_v54 = vld [vmem:[%s2805_s1] sm:$0xff] }
0x122e   :  { %vm1918_vm11 = vcmp.gt.s32.totalorder %v2764_v54, 0  ;;  %vm1946_vm5 = vcmp.ge.s32.totalorder %v2764_v54, 0  ;;  %vm1944_vm10 = vcmp.eq.s32.totalorder %v2764_v54, 1 }
0x122f   :  { %v1709_v56 = vadd.f32 %v2193_v42, %v1706_v55  ;;  %1882 = vmatpush.msra.mxu0 %v1857_v48  ;;  %v2378_v55 = vmov 3   ;;  %v1948_v47 = vsel %vm1946_vm5, 1, %v2360_v0 }
0x1230   :  { %2173 = vset.pattern.permute.xlu0 %v2378_v55  ;;  %2174 = vset.pattern.permute.xlu2 %v2378_v55 }
0x1231   :  { %2112 = vmatmul.msk.f32.gmra.mxu2 %vm116_vm6, %v1709_v56  ;;  %1883 = vmatpush.msra.mxu0 %v1856_v49 }
0x1292   :  { %v1739_v6 = vpop.f32.mrf.mxu2 }
0x1293   :  { %v1740_v7 = vadd.f32 %v2194_v4, %v1739_v6  ;;  %v2197_v6 = vld [vmem:[#allocation2 + $0x1af] ss:$0 sm:$0xff] }
0x1295   :  { %v1745_v8 = vmul.f32 %v1740_v7, %v1740_v7 }
0x1297   :  { %v1747_v9 = vmul.f32 %v1745_v8, %v1740_v7 }
0x1299   :  { %v1749_v10 = vmul.f32 0.044715, %v1747_v9 }
0x129b   :  { %v1751_v57 = vadd.f32 %v1749_v10, %v1740_v7 }
0x129d   :  { %v1753_v12 = vmul.f32 0.7978846, %v1751_v57 }
0x129f   :  { %2285 = vtanh.f32 %v1753_v12 }
0x12a5   :  { %v2286_v14 = vpop.eup %2285 }
0x12a6   :  { %v1757_v15 = vadd.f32 1.0, %v2286_v14 }
0x12a8   :  { %v1759_v16 = vmul.f32 0.5, %v1757_v15 }
0x12aa   :  { %v1761_v17 = vmul.f32 %v1759_v16, %v1740_v7 }
0x12ac   :  { %2113 = vmatmul.msk.f32.vlgmr.msra.gmra.mxu3 %vm938_vm13, %v1761_v17 }
0x12b4   :  { %v1742_v33 = vpop.f32.mrf.mxu2 }
0x12b5   :  { %v1743_v11 = vadd.f32 %v2194_v4, %v1742_v33 }
0x12b7   :  { %v1746_v18 = vmul.f32 %v1743_v11, %v1743_v11 }
0x12b9   :  { %v1748_v34 = vmul.f32 %v1746_v18, %v1743_v11 }
0x12bb   :  { %v1750_v22 = vmul.f32 0.044715, %v1748_v34 }
0x12bd   :  { %v1752_v13 = vadd.f32 %v1750_v22, %v1743_v11 }
0x12bf   :  { %v1754_v19 = vmul.f32 0.7978846, %v1752_v13  ;;  %v2198_v13 = vld [vmem:[#allocation2 + $0x1d0] ss:$0 sm:$0xff] }
0x12c1   :  { %2287 = vtanh.f32 %v1754_v19 }
0x12c7   :  { %v2288_v20 = vpop.eup %2287 }
0x12c8   :  { %v1758_v27 = vadd.f32 1.0, %v2288_v20 }
0x12ca   :  { %v1760_v23 = vmul.f32 0.5, %v1758_v27  ;;  %v2304_v27 = vld [vmem:[%s2805_s1 + $0x8] sm:$0xff]  ;;  %s2379_s1 = smov 127  }
0x12cb   :  { %vm1920_vm7 = vcmp.gt.s32.totalorder %v2304_v27, 0  ;;  %vm1947_vm4 = vcmp.ge.s32.totalorder %v2304_v27, 0  ;;  %vm1945_vm8 = vcmp.eq.s32.totalorder %v2304_v27, 1 }
0x12cc   :  { %v1762_v25 = vmul.f32 %v1760_v23, %v1743_v11  ;;  %v1921_v23 = vsel %vm1920_vm7, %v2304_v27, 0  ;;  %vm2024_vm7 = vcmask 0  }
0x12ce   :  { %2114 = vmatmul.msk.f32.gmra.mxu3 %vm938_vm13, %v1762_v25 }
0x132f   :  { %v1796_v63 = vpop.f32.mrf.mxu3 }
0x1330   :  { %v1797_v28 = vadd.f32 %v2195_v26, %v1796_v63 }
0x1332   :  { %v1802_v29 = vadd.f32 %v1797_v28, %v2745_v31 }
0x1334   :  { %v1806_v30 = vsel %vm116_vm6, %v1802_v29, 0.0 }
0x1335   :  { %1807 = vadd.xlane.f32.xlu0 %v1806_v30 }
0x1351   :  { %v1799_v32 = vpop.f32.mrf.mxu3 }
0x1352   :  { %v1800_v36 = vadd.f32 %v2195_v26, %v1799_v32 }
0x1354   :  { %v1803_v37 = vadd.f32 %v1800_v36, %v1709_v56  ;;  %v1919_v56 = vsel %vm1918_vm11, %v2764_v54, 0 }
0x1356   :  { %v1809_v38 = vsel %vm116_vm6, %v1803_v37, 0.0 }
0x1357   :  { %1810 = vadd.xlane.f32.xlu0 %v1809_v38 }
0x13a8   :  { %v1808_v41 = vpop.xlane.xlu0 %1807 }
0x13a9   :  { %v1812_v52 = vmul.f32 %v1808_v41, %v2428_v35 }
0x13ab   :  { %v1814_v39 = vsub.f32 %v1802_v29, %v1812_v52 }
0x13ad   :  { %v1816_v40 = vmul.f32 %v1814_v39, %v1814_v39 }
0x13af   :  { %v1818_v42 = vsel %vm116_vm6, %v1816_v40, 0.0 }
0x13b0   :  { %1819 = vadd.xlane.f32.xlu0 %v1818_v42 }
0x13ca   :  { %v1811_v5 = vpop.xlane.xlu0 %1810 }
0x13cb   :  { %v1813_v31 = vmul.f32 %v1811_v5, %v2428_v35 }
0x13cd   :  { %v1815_v43 = vsub.f32 %v1803_v37, %v1813_v31  ;;  %v1949_v31 = vsel %vm1947_vm4, 1, %v2360_v0 }
0x13cf   :  { %v1817_v44 = vmul.f32 %v1815_v43, %v1815_v43 }
0x13d1   :  { %v1821_v45 = vsel %vm116_vm6, %v1817_v44, 0.0 }
0x13d2   :  { %1822 = vadd.xlane.f32.xlu0 %v1821_v45 }
0x13e6   :  { %1923 = vperm.xlu0 %2173, %v1919_v56  }
0x13ee   :  { %1952 = vrot.lane.b32.xlu0 %v1949_v31, %s2379_s1 }
0x1423   :  { %v1820_v50 = vpop.xlane.xlu0 %1819 }
0x1424   :  { %v1824_v51 = vmul.f32 %v1820_v50, %v2428_v35 }
0x1426   :  { %v1826_v53 = vadd.f32 1e-12, %v1824_v51 }
0x1428   :  { %2289 = vrsqrt.f32 %v1826_v53  ;;  %vm1834_vm13 = vweird.f32 %v1826_v53 }
0x142e   :  { %v2290_v58 = vpop.eup %2289 }
0x142f   :  { %v1829_v59 = vmul.f32 %v2290_v58, %v1826_v53  ;;  %vm1835_vm12 = vweird.f32 %v2290_v58 }
0x1430   :  { %vm1836_vm14 = vmor %vm1834_vm13, %vm1835_vm12 }
0x1431   :  { %v1830_v60 = vmul.f32 %v2290_v58, %v1829_v59 }
0x1433   :  { %v1831_v61 = vmul.f32 0.5, %v1830_v60 }
0x1435   :  { %v1832_v62 = vsub.f32 1.5, %v1831_v61 }
0x1437   :  { %v1833_v1 = vmul.f32 %v2290_v58, %v1832_v62 }
0x1439   :  { %v1837_v3 = vsel %vm1836_vm14, %v2290_v58, %v1833_v1  ;;  %vm1972_vm14 = vcmask 7168  }
0x143a   :  { %v1848_v4 = vmul.f32 %v1837_v3, %v1814_v39 }
0x143c   :  { %v1851_v7 = vmul.f32 %v2196_v2, %v1848_v4 }
0x143e   :  { %v1854_v8 = vadd.f32 %v2197_v6, %v1851_v7 }
0x1440   :  { %2115 = vmatmul.msk.f32.vlgmr.msra.gmra.mxu0 %vm116_vm6, %v1854_v8 }
0x1445   :  { %v1823_v9 = vpop.xlane.xlu0 %1822 }
0x1446   :  { %v1825_v10 = vmul.f32 %v1823_v9, %v2428_v35 }
0x1448   :  { %v1827_v57 = vadd.f32 1e-12, %v1825_v10 }
0x144a   :  { %2291 = vrsqrt.f32 %v1827_v57  ;;  %vm1844_vm1 = vweird.f32 %v1827_v57 }
0x1450   :  { %v2292_v12 = vpop.eup %2291 }
0x1451   :  { %v1839_v14 = vmul.f32 %v2292_v12, %v1827_v57  ;;  %vm1845_vm15 = vweird.f32 %v2292_v12 }
0x1452   :  { %vm1846_vm2 = vmor %vm1844_vm1, %vm1845_vm15 }
0x1453   :  { %v1840_v15 = vmul.f32 %v2292_v12, %v1839_v14 }
0x1455   :  { %v1841_v16 = vmul.f32 0.5, %v1840_v15 }
0x1457   :  { %v1842_v17 = vsub.f32 1.5, %v1841_v16 }
0x1458   :  { %v1924_v25 = vpop.permute.xlu0 %1923 }
0x1459   :  { %v1843_v33 = vmul.f32 %v2292_v12, %v1842_v17 }
0x145b   :  { %v1847_v11 = vsel %vm1846_vm2, %v2292_v12, %v1843_v33 }
0x145c   :  { %v1849_v18 = vmul.f32 %v1847_v11, %v1815_v43 }
0x145e   :  { %v1852_v34 = vmul.f32 %v2196_v2, %v1849_v18 }
0x1460   :  { %v1855_v22 = vadd.f32 %v2197_v6, %v1852_v34  ;;  %v1953_v55 = vpop.permute.xlu0 %1952 }
0x1461   :  { %vm1955_vm9 = vcmp.ne.s32.totalorder %v1953_v55, 0 }
0x1462   :  { %2116 = vmatmul.msk.f32.gmra.mxu0 %vm116_vm6, %v1855_v22  ;;  %vm1928_vm6 = vcmp.eq.s32.totalorder %v2420_v21, %v1924_v25  ;;  %vm1957_vm11 = vmand %vm1945_vm8, %vm1955_vm9 }
0x1463   :  { %v2117_v29 = vsel %vm1928_vm6, 1.0, %v2363_v24  ;;  %v2120_v61 = vsel %vm1957_vm11, 1.0, %v2363_v24 }
0x14bd   :  { %v1885_v19 = vpop.f32.mrf.mxu0 }
0x14be   :  { %v1886_v35 = vadd.f32 %v2198_v13, %v1885_v19 }
0x14c0   :  { %1892 = vst.msk [vmem:[%s2807_s3] sm:$0xff] %vm1891_vm3, %v1886_v35  ;;  %v1894_v20 = vsel %vm1891_vm3, %v1886_v35, -inf  ;;  %v1934_v30 = vmul.f32 %v2117_v29, %v1886_v35 }
0x14c1   :  { %1895 = vmax.xlane.f32.xlu2 %v1894_v20 }
0x14c2   :  { %v1936_v32 = vsel %vm1891_vm3, %v1934_v30, 0.0 }
0x14d9   :  { %1926 = vperm.xlu2 %2174, %v1921_v23  }
0x14df   :  { %v1888_v26 = vpop.f32.mrf.mxu0 }
0x14e0   :  { %v1889_v63 = vadd.f32 %v2198_v13, %v1888_v26 }
0x14e2   :  { %1893 = vst.msk [vmem:[%s2807_s3 + $0x8] sm:$0xff] %vm1891_vm3, %v1889_v63  ;;  %v1897_v28 = vsel %vm1891_vm3, %v1889_v63, -inf  ;;  %s2380_s3 = smov 126  }
0x14e3   :  { %1898 = vmax.xlane.f32.xlu1 %v1897_v28 }
0x14eb   :  { %1937 = vadd.xlane.f32.xlu1 %v1936_v32 }
0x1534   :  { %v1896_v36 = vpop.xlane.xlu2 %1895 }
0x1535   :  { %v1900_v37 = vsub.f32 %v1886_v35, %v1896_v36 }
0x1537   :  { %v1902_v38 = vmul.f32 1.442695, %v1900_v37 }
0x1539   :  { %2293 = vpow2.f32 %v1902_v38 }
0x153c   :  { %v1927_v41 = vpop.permute.xlu2 %1926 }
0x153d   :  { %vm1929_vm0 = vcmp.eq.s32.totalorder %v2420_v21, %v1927_v41 }
0x153e   :  { %v2118_v52 = vsel %vm1929_vm0, 1.0, %v2363_v24 }
0x153f   :  { %v2294_v39 = vpop.eup %2293  ;;  %v1935_v40 = vmul.f32 %v2118_v52, %v1889_v63 }
0x1540   :  { %v1906_v42 = vsel %vm1891_vm3, %v2294_v39, 0.0 }
0x1541   :  { %1907 = vadd.xlane.f32.xlu1 %v1906_v42  ;;  %v1939_v5 = vsel %vm1891_vm3, %v1935_v40, 0.0 }
0x1542   :  { %1940 = vadd.xlane.f32.xlu2 %v1939_v5 }
0x1556   :  { %v1899_v43 = vpop.xlane.xlu1 %1898 }
0x1557   :  { %v1901_v44 = vsub.f32 %v1889_v63, %v1899_v43 }
0x1559   :  { %v1904_v45 = vmul.f32 1.442695, %v1901_v44 }
0x155b   :  { %2295 = vpow2.f32 %v1904_v45 }
0x155e   :  { %v1938_v48 = vpop.xlane.xlu1 %1937 }
0x1561   :  { %v2296_v21 = vpop.eup %2295 }
0x1562   :  { %v1909_v46 = vsel %vm1891_vm3, %v2296_v21, 0.0 }
0x1563   :  { %1910 = vadd.xlane.f32.xlu1 %v1909_v46 }
0x157c   :  { %1950 = vrot.lane.b32.xlu1 %v1948_v47, %s2379_s1 }
0x15b4   :  { %v1908_v49 = vpop.xlane.xlu1 %1907 }
0x15b5   :  { %2297 = vlog2.f32 %v1908_v49  ;;  %v1941_v4 = vpop.xlane.xlu2 %1940 }
0x15bb   :  { %v2298_v51 = vpop.eup %2297 }
0x15bc   :  { %v1913_v53 = vmul.f32 0.6931472, %v2298_v51 }
0x15be   :  { %v1916_v58 = vadd.f32 %v1913_v53, %v1896_v36 }
0x15c0   :  { %v1942_v0 = vsub.f32 %v1916_v58, %v1938_v48 }
0x15d6   :  { %v1911_v50 = vpop.xlane.xlu1 %1910 }
0x15d7   :  { %2299 = vlog2.f32 %v1911_v50 }
0x15dd   :  { %v2300_v56 = vpop.eup %2299 }
0x15de   :  { %v1915_v59 = vmul.f32 0.6931472, %v2300_v56 }
0x15e0   :  { %v1917_v1 = vadd.f32 %v1915_v59, %v1899_v43 }
0x15e2   :  { %v1943_v6 = vsub.f32 %v1917_v1, %v1941_v4 }
0x15e4   :  { %v1963_v7 = vmul.f32 %v2120_v61, %v1943_v6 }
0x15ee   :  { %v1951_v60 = vpop.permute.xlu1 %1950 }
0x15ef   :  { %vm1954_vm12 = vcmp.ne.s32.totalorder %v1951_v60, 0 }
0x15f0   :  { %vm1956_vm13 = vmand %vm1944_vm10, %vm1954_vm12 }
0x15f1   :  { %v2119_v62 = vsel %vm1956_vm13, 1.0, %v2363_v24 }
0x15f2   :  { %v1962_v2 = vmul.f32 %v2119_v62, %v1942_v0  ;;  %v2175_v3 = vpack.i.bf16 %v2120_v61, %v2119_v62 }
0x15f4   :  { %1966 = vrot.lane.b32.xlu0 %v1962_v2, %s2380_s3  ;;  %2176 = vrot.lane.b32.xlu1 %v2175_v3, %s2380_s3 }
0x15fc   :  { %1968 = vrot.lane.b32.xlu0 %v1963_v7, %s2380_s3 }
0x1666   :  { %v1967_v54 = vpop.permute.xlu0 %1966  ;;  %v2177_v8 = vpop.permute.xlu1 %2176 }
0x1667   :  { %v2179_v9 = vunpack.i.h.bf16 %v2177_v8  ;;  %v2178_v10 = vunpack.i.l.bf16 %v2177_v8  ;;  %v1973_v15 = vsel %vm1972_vm14, %v1967_v54, 0.0 }
0x1669   :  { %v1993_v57 = vsel %vm1972_vm14, %v2178_v10, 0.0  ;;  %v1994_v12 = vsel %vm1972_vm14, %v2179_v9, 0.0 }
0x166a   :  { %v1995_v14 = vadd.f32 %v1994_v12, %v1993_v57 }
0x166c   :  { %1996 = vadd.xlane.f32.xlu1 %v1995_v14 }
0x166e   :  { %v1969_v24 = vpop.permute.xlu0 %1968 }
0x166f   :  { %v1974_v16 = vsel %vm1972_vm14, %v1969_v24, 0.0 }
0x1670   :  { %v1975_v17 = vadd.f32 %v1974_v16, %v1973_v15 }
0x1672   :  { %1976 = vadd.xlane.f32.xlu0 %v1975_v17 }
0x16df   :  { %v1997_v33 = vpop.xlane.xlu1 %1996 }
0x16e0   :  { %v1998_v11 = vrot.slane %v1997_v33, 4 }
0x16e2   :  { %v1999_v18 = vadd.f32 %v1998_v11, %v1997_v33 }
0x16e4   :  { %v2000_v34 = vrot.slane %v1999_v18, 2 }
0x16e5   :  { %v1977_v22 = vpop.xlane.xlu0 %1976 }
0x16e6   :  { %v1978_v13 = vrot.slane %v1977_v22, 4  ;;  %v2001_v35 = vadd.f32 %v2000_v34, %v1999_v18 }
0x16e8   :  { %v1979_v19 = vadd.f32 %v1978_v13, %v1977_v22  ;;  %v2002_v23 = vrot.slane %v2001_v35, 1 }
0x16ea   :  { %v1980_v20 = vrot.slane %v1979_v19, 2  ;;  %v2003_v63 = vadd.f32 %v2002_v23, %v2001_v35 }
0x16ec   :  { %v1981_v27 = vadd.f32 %v1980_v20, %v1979_v19 }
0x16ee   :  { %v1982_v25 = vrot.slane %v1981_v27, 1 }
0x16f0   :  { %v1983_v26 = vadd.f32 %v1982_v25, %v1981_v27 }
0x16f2   :  { %2121 = vpush %v1983_v26 }
0x16f3   :  { %2123 = vpush %v2003_v63 }
0x1723   :  { %s2798_s21 = spop %2121 }
0x1724   :  { %s2124_s22 = spop %2123 }
0x1725   :  { %s2005_s0 = smax.f32 %s2381_s23, %s2124_s22 }
0x1726   :  { %v2006_v28 = vstv %s2005_s0 }
0x1727   :  { %2301 = vrcp.f32 %v2006_v28  ;;  %v2018_v36 = vand.u32 2147483648, %v2006_v28  ;;  %v2016_v38 = vand.u32 2147483647, %v2006_v28  ;;  %vm2012_vm1 = vweird.f32 %v2006_v28 }
0x1729   :  { %v2019_v52 = vor.u32 1.1754944e-38, %v2018_v36  ;;  %vm2017_vm3 = vcmp.eq.f32.partialorder %v2016_v38, 8.507059e+37 }
0x172d   :  { %v2302_v29 = vpop.eup %2301 }
0x172e   :  { %v2008_v30 = vmul.f32 %v2302_v29, %v2006_v28  ;;  %vm2013_vm15 = vweird.f32 %v2302_v29 }
0x172f   :  { %vm2014_vm2 = vmor %vm2012_vm1, %vm2013_vm15 }
0x1730   :  { %v2009_v32 = vsub.f32 1.0, %v2008_v30 }
0x1732   :  { %v2010_v37 = vmul.f32 %v2302_v29, %v2009_v32 }
0x1734   :  { %v2011_v41 = vadd.f32 %v2302_v29, %v2010_v37 }
0x1736   :  { %v2015_v39 = vsel %vm2014_vm2, %v2302_v29, %v2011_v41 }
0x1737   :  { %v2020_v40 = vsel %vm2017_vm3, %v2019_v52, %v2015_v39 }
0x1738   :  { %2125 = vpush %v2020_v40 }
0x1769   :  { %s2126_s28 = spop %2125 }
0x176a   :  { %s2022_s29 = smul.f32 %s2126_s28, %s2798_s21 }
0x176c   :  { %v2023_v42 = vstv %s2022_s29 }
0x176d   :  { %2025 = vst.msk [vmem:[#allocation5] sm:$0x1] %vm2024_vm7, %v2023_v42 }
0x176e   :  { %2038 = dma.vmem_to_hbm [thread:$0]  %s2034_s25, 16, %s2036_s2, [#allocation4]  }
0x176f   :  { %2355 = dma.done.wait [#allocation4], 16  }
0x1770   :  { %2356 = vsyncadd [#allocation4], 4294967280 }
0x1771   :  { %2045 = vsyncpa [#allocation3], 1 }
0x1772   :  { %2046 = vsyncpa [#allocation4], 1 }

</bundles_post_ra>
